<compile_context>
chip_gen: v6e
topology: v6e:2x2x1
jax: 0.10.0
libtpu: 0.0.40
codegen_flags: <defaults>
</compile_context>

<pallas_src>
import math

import jax
import jax.numpy as jnp
from jax.experimental import pallas as pl
from jax.experimental.pallas import tpu as pltpu

EPS = 1e-5


# ---------------------------------------------------------------------------
# Fused Pallas kernel (one grid step == one image, layout = (channels, H*W))
# ---------------------------------------------------------------------------
def _make_bottle2neck_kernel(H, W, width, scale, nums):
    HW = H * W
    PAD = W + 1  # left/right zero pad (lanes) so every tap slice stays in-bounds

    def kernel(x_ref, w1_ref, b1_ref, wc_ref, bc_ref, w3_ref, b3_ref, o_ref):
        # x_ref : (Cin, HW)               f32   (also the residual)
        # w1_ref: (width*scale, Cin)      bf16  conv1 weight, BN1 scale folded
        # b1_ref: (width*scale, 1)        f32   folded BN1 bias
        # wc_ref: (nums, width, 9*width)  bf16  3x3 weights (K = tap*width+cin)
        # bc_ref: (nums, width, 1)        f32   folded BN biases of group convs
        # w3_ref: (Cout, width*scale)     bf16  conv3 weight, BN3 scale folded
        # b3_ref: (Cout, 1)               f32
        # o_ref : (Cout, HW)              f32
        x = x_ref[...]                                             # f32 residual

        # ---- conv1 (1x1) + folded BN1 + ReLU (bf16 MXU, f32 accumulate) ----
        out1 = jnp.dot(w1_ref[...], x.astype(jnp.bfloat16),
                       preferred_element_type=jnp.float32)
        out1 = jnp.maximum(out1 + b1_ref[...], 0.0)                # (ws, HW) f32

        # dx boundary masks as lane vectors (2D iota; 1D iota unsupported).
        col = jax.lax.broadcasted_iota(jnp.int32, (1, HW), 1) % W
        mask_l = (col >= 1).astype(jnp.float32)                    # valid for dx = -1
        mask_r = (col <= W - 2).astype(jnp.float32)                # valid for dx = +1

        zpad = jnp.zeros((width, PAD), jnp.float32)

        # ---- hierarchical Res2Net group chain, fully vreg/VMEM resident -----
        group_outs = []
        sp = None
        for i in range(nums):
            spx_i = out1[i * width:(i + 1) * width, :]
            sp = spx_i if i == 0 else sp + spx_i                   # (width, HW)
            spz = jnp.concatenate([zpad, sp, zpad], axis=1)        # (width, HW+2*PAD)

            # 9 shifted taps -> one K = 9*width matmul.
            taps = []
            for dy in (-1, 0, 1):
                for dx in (-1, 0, 1):
                    a = PAD + dy * W + dx                          # static lane offset
                    v = spz[:, a:a + HW]                           # (width, HW)
                    if dx == -1:
                        v = v * mask_l
                    elif dx == 1:
                        v = v * mask_r
                    taps.append(v)
            xk = jnp.concatenate(taps, axis=0).astype(jnp.bfloat16)  # (9*width, HW)
            y = jnp.dot(wc_ref[i], xk, preferred_element_type=jnp.float32)
            sp = jnp.maximum(y + bc_ref[i], 0.0)                   # (width, HW) f32
            group_outs.append(sp)

        if scale != 1:
            group_outs.append(out1[nums * width:scale * width, :])
        cat = jnp.concatenate(group_outs, axis=0)                  # (width*scale, HW)

        # ---- conv3 (1x1) + folded BN3 + residual add + ReLU ------------------
        y = jnp.dot(w3_ref[...], cat.astype(jnp.bfloat16),
                    preferred_element_type=jnp.float32)
        o_ref[...] = jnp.maximum(y + b3_ref[...] + x, 0.0).astype(o_ref.dtype)

    return kernel


# ---------------------------------------------------------------------------
# Parameter construction / BN folding
# ---------------------------------------------------------------------------
def make_params(key, inplanes, planes, base_width, scale):
    width = int(math.floor(planes * (base_width / 64.0)))
    nums = 1 if scale == 1 else scale - 1
    expansion = 4

    def bn_params(k, c):
        k1, k2, k3, k4 = jax.random.split(k, 4)
        gamma = 1.0 + 0.1 * jax.random.normal(k1, (c,), jnp.float32)
        beta = 0.1 * jax.random.normal(k2, (c,), jnp.float32)
        mean = 0.1 * jax.random.normal(k3, (c,), jnp.float32)
        var = jax.random.uniform(k4, (c,), jnp.float32, 0.5, 1.5)
        return gamma, beta, mean, var

    keys = jax.random.split(key, 4 + 2 * nums)
    p = {}
    p['w1'] = 0.1 * jax.random.normal(keys[0], (inplanes, width * scale), jnp.float32)
    p['bn1'] = bn_params(keys[1], width * scale)
    p['wc'] = [0.1 * jax.random.normal(keys[2 + i], (3, 3, width, width), jnp.float32)
               for i in range(nums)]
    p['bnc'] = [bn_params(keys[2 + nums + i], width) for i in range(nums)]
    p['w3'] = 0.1 * jax.random.normal(keys[2 + 2 * nums],
                                      (width * scale, planes * expansion), jnp.float32)
    p['bn3'] = bn_params(keys[3 + 2 * nums], planes * expansion)
    p['width'] = width
    p['nums'] = nums
    p['scale'] = scale
    return p


def fold_bn(bn):
    gamma, beta, mean, var = bn
    s = gamma / jnp.sqrt(var + EPS)
    b = beta - mean * s
    return s, b


# ---------------------------------------------------------------------------
# Pallas-backed forward (stride=1, stype='normal', no downsample)
# ---------------------------------------------------------------------------
def bottle2neck_forward(x_nchw, p):
    """x_nchw: (N, inplanes, H, W) -> (N, planes*4, H, W)."""
    width, nums, scale = p['width'], p['nums'], p['scale']
    n, cin, h, w = x_nchw.shape
    cout = p['w3'].shape[1]
    assert cin == cout, "residual path without downsample needs inplanes == planes*4"
    HW = h * w
    assert HW % 128 == 0, "H*W must be a multiple of 128 for the lane-dense layout"

    # Native NCHW layout -> (channels, pixels) per image; no transposes needed.
    x2d = x_nchw.reshape(n * cin, HW).astype(jnp.float32)

    # Fold eval-mode BN scale into conv weights (wrapper-side, once), cast bf16.
    s1, b1 = fold_bn(p['bn1'])
    w1t = (p['w1'] * s1[None, :]).T.astype(jnp.bfloat16)           # (width*scale, cin)
    wct, bct = [], []
    for i in range(nums):
        sc, bc = fold_bn(p['bnc'][i])
        wct.append((p['wc'][i].reshape(9 * width, width) * sc[None, :]).T)
        bct.append(bc)
    wc = jnp.stack(wct, axis=0).astype(jnp.bfloat16)               # (nums, width, 9*width)
    bcs = jnp.stack(bct, axis=0)[..., None].astype(jnp.float32)    # (nums, width, 1)
    s3, b3 = fold_bn(p['bn3'])
    w3t = (p['w3'] * s3[None, :]).T.astype(jnp.bfloat16)           # (cout, width*scale)

    kernel = _make_bottle2neck_kernel(h, w, width, scale, nums)

    y2d = pl.pallas_call(
        kernel,
        out_shape=jax.ShapeDtypeStruct((n * cout, HW), jnp.float32),
        grid=(n,),
        in_specs=[
            pl.BlockSpec((cin, HW), lambda i: (i, 0)),
            pl.BlockSpec((width * scale, cin), lambda i: (0, 0)),
            pl.BlockSpec((width * scale, 1), lambda i: (0, 0)),
            pl.BlockSpec((nums, width, 9 * width), lambda i: (0, 0, 0)),
            pl.BlockSpec((nums, width, 1), lambda i: (0, 0, 0)),
            pl.BlockSpec((cout, width * scale), lambda i: (0, 0)),
            pl.BlockSpec((cout, 1), lambda i: (0, 0)),
        ],
        out_specs=pl.BlockSpec((cout, HW), lambda i: (i, 0)),
        compiler_params=pltpu.CompilerParams(
            dimension_semantics=("parallel",),
            vmem_limit_bytes=32 * 1024 * 1024,
        ),
    )(x2d, w1t, b1.reshape(-1, 1), wc, bcs, w3t, b3.reshape(-1, 1))

    return y2d.reshape(n, cout, h, w)


# ---------------------------------------------------------------------------
# Pure-JAX reference (mirrors the PyTorch forward, eval-mode BN, full f32)
# ---------------------------------------------------------------------------
def ref_forward(x_nchw, p):
    width, nums, scale = p['width'], p['nums'], p['scale']

    def bn(x, params):
        g, b, m, v = params
        return ((x - m[None, :, None, None]) / jnp.sqrt(v[None, :, None, None] + EPS)
                * g[None, :, None, None] + b[None, :, None, None])

    def conv1x1(x, w2d):
        wk = w2d.T[:, :, None, None]  # OIHW
        return jax.lax.conv_general_dilated(
            x, wk, (1, 1), 'VALID', dimension_numbers=('NCHW', 'OIHW', 'NCHW'))

    def conv3x3(x, w):
        wk = jnp.transpose(w, (3, 2, 0, 1))  # OIHW
        return jax.lax.conv_general_dilated(
            x, wk, (1, 1), ((1, 1), (1, 1)),
            dimension_numbers=('NCHW', 'OIHW', 'NCHW'))

    out = jax.nn.relu(bn(conv1x1(x_nchw, p['w1']), p['bn1']))
    spx = [out[:, i * width:(i + 1) * width] for i in range(scale)]
    outs = []
    sp = None
    for i in range(nums):
        sp = spx[i] if i == 0 else sp + spx[i]
        sp = jax.nn.relu(bn(conv3x3(sp, p['wc'][i]), p['bnc'][i]))
        outs.append(sp)
    if scale != 1:
        outs.append(spx[nums])
    out = jnp.concatenate(outs, axis=1)
    out = bn(conv1x1(out, p['w3']), p['bn3'])
    return jax.nn.relu(out + x_nchw)


# ---------------------------------------------------------------------------
if __name__ == "__main__":
    # inplanes=32, planes=8, baseWidth=32, scale=4, stride=1, stype='normal',
    # downsample=None  ->  width=4, nums=3, out channels = planes*4 = 32.
    inplanes, planes, base_width, scale = 32, 8, 32, 4
    N, H, W = 2, 16, 16

    key = jax.random.PRNGKey(0)
    kx, kp = jax.random.split(key)
    x = jax.random.normal(kx, (N, inplanes, H, W), jnp.float32)
    params = make_params(kp, inplanes, planes, base_width, scale)

    out = jax.block_until_ready(bottle2neck_forward(x, params))
    ref = jax.block_until_ready(ref_forward(x, params))

    assert out.shape == (N, planes * 4, H, W), out.shape
    # bf16 MXU operands -> loosened tolerance (accumulation & epilogue are f32).
    assert jnp.allclose(out, ref, atol=5e-2, rtol=5e-2), \
        f"max abs diff {jnp.max(jnp.abs(out - ref))}"

    print("KERNEL_OK")
</pallas_src>

<mosaic_0001>
module attributes {stable_mosaic.version = 11 : i64} {
  func.func @kernel(%arg0: i32, %arg1: memref<32x256xf32, #tpu.memory_space<vmem>>, %arg2: memref<16x32xbf16, #tpu.memory_space<vmem>>, %arg3: memref<16x1xf32, #tpu.memory_space<vmem>>, %arg4: memref<3x4x36xbf16, #tpu.memory_space<vmem>>, %arg5: memref<3x4x1xf32, #tpu.memory_space<vmem>>, %arg6: memref<32x16xbf16, #tpu.memory_space<vmem>>, %arg7: memref<32x1xf32, #tpu.memory_space<vmem>>, %arg8: memref<32x256xf32, #tpu.memory_space<vmem>>) attributes {dimension_semantics = [#tpu.dimension_semantics<parallel>], iteration_bounds = array<i64: 2>, scalar_prefetch = 0 : i64, scratch_operands = 0 : i64, tpu.core_type = #tpu.core_type<tc>, window_params = [{transform_indices = @transform_0, window_bounds = array<i64: 32, 256>}, {pipeline_mode = #tpu.pipeline_mode<synchronous>, transform_indices = @transform_1, window_bounds = array<i64: 16, 32>}, {pipeline_mode = #tpu.pipeline_mode<synchronous>, transform_indices = @transform_2, window_bounds = array<i64: 16, 1>}, {pipeline_mode = #tpu.pipeline_mode<synchronous>, transform_indices = @transform_3, window_bounds = array<i64: 3, 4, 36>}, {pipeline_mode = #tpu.pipeline_mode<synchronous>, transform_indices = @transform_4, window_bounds = array<i64: 3, 4, 1>}, {pipeline_mode = #tpu.pipeline_mode<synchronous>, transform_indices = @transform_5, window_bounds = array<i64: 32, 16>}, {pipeline_mode = #tpu.pipeline_mode<synchronous>, transform_indices = @transform_6, window_bounds = array<i64: 32, 1>}, {transform_indices = @transform_7, window_bounds = array<i64: 32, 256>}]} {
    %c0 = arith.constant 0 : index
    %c0_0 = arith.constant 0 : index
    %0 = vector.load %arg1[%c0, %c0_0] : memref<32x256xf32, #tpu.memory_space<vmem>>, vector<32x256xf32>
    %c0_1 = arith.constant 0 : index
    %c0_2 = arith.constant 0 : index
    %1 = vector.load %arg2[%c0_1, %c0_2] : memref<16x32xbf16, #tpu.memory_space<vmem>>, vector<16x32xbf16>
    %2 = arith.truncf %0 : vector<32x256xf32> to vector<32x256xbf16>
    %cst = arith.constant dense<0.000000e+00> : vector<16x256xf32>
    %3 = tpu.matmul %1, %2, %cst {dimension_numbers = #tpu.dot_dimension_numbers<[1], [0], [0], [1], [0, 0, 1, 1], [], []>} : vector<16x32xbf16>, vector<32x256xbf16>, vector<16x256xf32> -> vector<16x256xf32>
    %c0_3 = arith.constant 0 : index
    %c0_4 = arith.constant 0 : index
    %4 = vector.load %arg3[%c0_3, %c0_4] : memref<16x1xf32, #tpu.memory_space<vmem>>, vector<16x1xf32>
    %5 = vector.broadcast %4 : vector<16x1xf32> to vector<16x256xf32>
    %6 = arith.addf %3, %5 : vector<16x256xf32>
    %cst_5 = arith.constant 0.000000e+00 : f32
    %7 = vector.broadcast %cst_5 : f32 to vector<16x256xf32>
    %8 = arith.maximumf %6, %7 : vector<16x256xf32>
    %9 = tpu.iota {dimensions = array<i32: 1>} : vector<1x256xi32>
    %c16_i32 = arith.constant 16 : i32
    %c0_i32 = arith.constant 0 : i32
    %10 = arith.cmpi eq, %c16_i32, %c0_i32 : i32
    %c1_i32 = arith.constant 1 : i32
    %11 = arith.select %10, %c1_i32, %c16_i32 : i32
    %12 = vector.broadcast %11 : i32 to vector<1x256xi32>
    %13 = arith.remsi %9, %12 : vector<1x256xi32>
    %c0_i32_6 = arith.constant 0 : i32
    %14 = vector.broadcast %c0_i32_6 : i32 to vector<1x256xi32>
    %15 = arith.cmpi ne, %13, %14 : vector<1x256xi32>
    %c0_i32_7 = arith.constant 0 : i32
    %16 = vector.broadcast %c0_i32_7 : i32 to vector<1x256xi32>
    %17 = arith.cmpi slt, %13, %16 : vector<1x256xi32>
    %c0_i32_8 = arith.constant 0 : i32
    %18 = arith.cmpi slt, %11, %c0_i32_8 : i32
    %19 = vector.broadcast %18 : i1 to vector<1x256xi1>
    %20 = vector.broadcast %19 : vector<1x256xi1> to vector<1x256xi1>
    %21 = arith.xori %17, %20 : vector<1x256xi1>
    %22 = arith.andi %21, %15 : vector<1x256xi1>
    %23 = vector.broadcast %11 : i32 to vector<1x256xi32>
    %24 = arith.addi %13, %23 : vector<1x256xi32>
    %25 = arith.select %22, %24, %13 : vector<1x256xi1>, vector<1x256xi32>
    %c1_i32_9 = arith.constant 1 : i32
    %26 = vector.broadcast %c1_i32_9 : i32 to vector<1x256xi32>
    %27 = arith.cmpi sge, %25, %26 : vector<1x256xi32>
    %28 = arith.extui %27 : vector<1x256xi1> to vector<1x256xi32>
    %29 = arith.sitofp %28 : vector<1x256xi32> to vector<1x256xf32>
    %c14_i32 = arith.constant 14 : i32
    %30 = vector.broadcast %c14_i32 : i32 to vector<1x256xi32>
    %31 = arith.cmpi sle, %25, %30 : vector<1x256xi32>
    %32 = arith.extui %31 : vector<1x256xi1> to vector<1x256xi32>
    %33 = arith.sitofp %32 : vector<1x256xi32> to vector<1x256xf32>
    %cst_10 = arith.constant 0.000000e+00 : f32
    %34 = vector.broadcast %cst_10 : f32 to vector<4x17xf32>
    %35 = vector.extract_strided_slice %8 {offsets = [0, 0], sizes = [4, 256], strides = [1, 1]} : vector<16x256xf32> to vector<4x256xf32>
    %36 = tpu.concatenate %34, %35, %34 in 1 : vector<4x17xf32>, vector<4x256xf32>, vector<4x17xf32> -> vector<4x290xf32>
    %37 = vector.extract_strided_slice %36 {offsets = [0, 0], sizes = [4, 256], strides = [1, 1]} : vector<4x290xf32> to vector<4x256xf32>
    %38 = vector.broadcast %29 : vector<1x256xf32> to vector<4x256xf32>
    %39 = arith.mulf %37, %38 : vector<4x256xf32>
    %40 = vector.extract_strided_slice %36 {offsets = [0, 1], sizes = [4, 256], strides = [1, 1]} : vector<4x290xf32> to vector<4x256xf32>
    %41 = vector.extract_strided_slice %36 {offsets = [0, 2], sizes = [4, 256], strides = [1, 1]} : vector<4x290xf32> to vector<4x256xf32>
    %42 = vector.broadcast %33 : vector<1x256xf32> to vector<4x256xf32>
    %43 = arith.mulf %41, %42 : vector<4x256xf32>
    %44 = vector.extract_strided_slice %36 {offsets = [0, 16], sizes = [4, 256], strides = [1, 1]} : vector<4x290xf32> to vector<4x256xf32>
    %45 = vector.broadcast %29 : vector<1x256xf32> to vector<4x256xf32>
    %46 = arith.mulf %44, %45 : vector<4x256xf32>
    %47 = vector.extract_strided_slice %36 {offsets = [0, 17], sizes = [4, 256], strides = [1, 1]} : vector<4x290xf32> to vector<4x256xf32>
    %48 = vector.extract_strided_slice %36 {offsets = [0, 18], sizes = [4, 256], strides = [1, 1]} : vector<4x290xf32> to vector<4x256xf32>
    %49 = vector.broadcast %33 : vector<1x256xf32> to vector<4x256xf32>
    %50 = arith.mulf %48, %49 : vector<4x256xf32>
    %51 = vector.extract_strided_slice %36 {offsets = [0, 32], sizes = [4, 256], strides = [1, 1]} : vector<4x290xf32> to vector<4x256xf32>
    %52 = vector.broadcast %29 : vector<1x256xf32> to vector<4x256xf32>
    %53 = arith.mulf %51, %52 : vector<4x256xf32>
    %54 = vector.extract_strided_slice %36 {offsets = [0, 33], sizes = [4, 256], strides = [1, 1]} : vector<4x290xf32> to vector<4x256xf32>
    %55 = vector.extract_strided_slice %36 {offsets = [0, 34], sizes = [4, 256], strides = [1, 1]} : vector<4x290xf32> to vector<4x256xf32>
    %56 = vector.broadcast %33 : vector<1x256xf32> to vector<4x256xf32>
    %57 = arith.mulf %55, %56 : vector<4x256xf32>
    %58 = tpu.concatenate %39, %40, %43, %46, %47, %50, %53, %54, %57 in 0 : vector<4x256xf32>, vector<4x256xf32>, vector<4x256xf32>, vector<4x256xf32>, vector<4x256xf32>, vector<4x256xf32>, vector<4x256xf32>, vector<4x256xf32>, vector<4x256xf32> -> vector<36x256xf32>
    %59 = arith.truncf %58 : vector<36x256xf32> to vector<36x256xbf16>
    %c0_11 = arith.constant 0 : index
    %c0_12 = arith.constant 0 : index
    %c0_13 = arith.constant 0 : index
    %60 = vector.load %arg4[%c0_11, %c0_12, %c0_13] : memref<3x4x36xbf16, #tpu.memory_space<vmem>>, vector<1x4x36xbf16>
    %61 = vector.shape_cast %60 : vector<1x4x36xbf16> to vector<4x36xbf16>
    %cst_14 = arith.constant dense<0.000000e+00> : vector<4x256xf32>
    %62 = tpu.matmul %61, %59, %cst_14 {dimension_numbers = #tpu.dot_dimension_numbers<[1], [0], [0], [1], [0, 0, 1, 1], [], []>} : vector<4x36xbf16>, vector<36x256xbf16>, vector<4x256xf32> -> vector<4x256xf32>
    %c0_15 = arith.constant 0 : index
    %c0_16 = arith.constant 0 : index
    %c0_17 = arith.constant 0 : index
    %63 = vector.load %arg5[%c0_15, %c0_16, %c0_17] : memref<3x4x1xf32, #tpu.memory_space<vmem>>, vector<1x4x1xf32>
    %64 = vector.shape_cast %63 : vector<1x4x1xf32> to vector<4x1xf32>
    %65 = vector.broadcast %64 : vector<4x1xf32> to vector<4x256xf32>
    %66 = arith.addf %62, %65 : vector<4x256xf32>
    %cst_18 = arith.constant 0.000000e+00 : f32
    %67 = vector.broadcast %cst_18 : f32 to vector<4x256xf32>
    %68 = arith.maximumf %66, %67 : vector<4x256xf32>
    %69 = vector.extract_strided_slice %8 {offsets = [4, 0], sizes = [4, 256], strides = [1, 1]} : vector<16x256xf32> to vector<4x256xf32>
    %70 = arith.addf %68, %69 : vector<4x256xf32>
    %71 = tpu.concatenate %34, %70, %34 in 1 : vector<4x17xf32>, vector<4x256xf32>, vector<4x17xf32> -> vector<4x290xf32>
    %72 = vector.extract_strided_slice %71 {offsets = [0, 0], sizes = [4, 256], strides = [1, 1]} : vector<4x290xf32> to vector<4x256xf32>
    %73 = vector.broadcast %29 : vector<1x256xf32> to vector<4x256xf32>
    %74 = arith.mulf %72, %73 : vector<4x256xf32>
    %75 = vector.extract_strided_slice %71 {offsets = [0, 1], sizes = [4, 256], strides = [1, 1]} : vector<4x290xf32> to vector<4x256xf32>
    %76 = vector.extract_strided_slice %71 {offsets = [0, 2], sizes = [4, 256], strides = [1, 1]} : vector<4x290xf32> to vector<4x256xf32>
    %77 = vector.broadcast %33 : vector<1x256xf32> to vector<4x256xf32>
    %78 = arith.mulf %76, %77 : vector<4x256xf32>
    %79 = vector.extract_strided_slice %71 {offsets = [0, 16], sizes = [4, 256], strides = [1, 1]} : vector<4x290xf32> to vector<4x256xf32>
    %80 = vector.broadcast %29 : vector<1x256xf32> to vector<4x256xf32>
    %81 = arith.mulf %79, %80 : vector<4x256xf32>
    %82 = vector.extract_strided_slice %71 {offsets = [0, 17], sizes = [4, 256], strides = [1, 1]} : vector<4x290xf32> to vector<4x256xf32>
    %83 = vector.extract_strided_slice %71 {offsets = [0, 18], sizes = [4, 256], strides = [1, 1]} : vector<4x290xf32> to vector<4x256xf32>
    %84 = vector.broadcast %33 : vector<1x256xf32> to vector<4x256xf32>
    %85 = arith.mulf %83, %84 : vector<4x256xf32>
    %86 = vector.extract_strided_slice %71 {offsets = [0, 32], sizes = [4, 256], strides = [1, 1]} : vector<4x290xf32> to vector<4x256xf32>
    %87 = vector.broadcast %29 : vector<1x256xf32> to vector<4x256xf32>
    %88 = arith.mulf %86, %87 : vector<4x256xf32>
    %89 = vector.extract_strided_slice %71 {offsets = [0, 33], sizes = [4, 256], strides = [1, 1]} : vector<4x290xf32> to vector<4x256xf32>
    %90 = vector.extract_strided_slice %71 {offsets = [0, 34], sizes = [4, 256], strides = [1, 1]} : vector<4x290xf32> to vector<4x256xf32>
    %91 = vector.broadcast %33 : vector<1x256xf32> to vector<4x256xf32>
    %92 = arith.mulf %90, %91 : vector<4x256xf32>
    %93 = tpu.concatenate %74, %75, %78, %81, %82, %85, %88, %89, %92 in 0 : vector<4x256xf32>, vector<4x256xf32>, vector<4x256xf32>, vector<4x256xf32>, vector<4x256xf32>, vector<4x256xf32>, vector<4x256xf32>, vector<4x256xf32>, vector<4x256xf32> -> vector<36x256xf32>
    %94 = arith.truncf %93 : vector<36x256xf32> to vector<36x256xbf16>
    %c1 = arith.constant 1 : index
    %c0_19 = arith.constant 0 : index
    %c0_20 = arith.constant 0 : index
    %95 = vector.load %arg4[%c1, %c0_19, %c0_20] : memref<3x4x36xbf16, #tpu.memory_space<vmem>>, vector<1x4x36xbf16>
    %96 = vector.shape_cast %95 : vector<1x4x36xbf16> to vector<4x36xbf16>
    %cst_21 = arith.constant dense<0.000000e+00> : vector<4x256xf32>
    %97 = tpu.matmul %96, %94, %cst_21 {dimension_numbers = #tpu.dot_dimension_numbers<[1], [0], [0], [1], [0, 0, 1, 1], [], []>} : vector<4x36xbf16>, vector<36x256xbf16>, vector<4x256xf32> -> vector<4x256xf32>
    %c1_22 = arith.constant 1 : index
    %c0_23 = arith.constant 0 : index
    %c0_24 = arith.constant 0 : index
    %98 = vector.load %arg5[%c1_22, %c0_23, %c0_24] : memref<3x4x1xf32, #tpu.memory_space<vmem>>, vector<1x4x1xf32>
    %99 = vector.shape_cast %98 : vector<1x4x1xf32> to vector<4x1xf32>
    %100 = vector.broadcast %99 : vector<4x1xf32> to vector<4x256xf32>
    %101 = arith.addf %97, %100 : vector<4x256xf32>
    %cst_25 = arith.constant 0.000000e+00 : f32
    %102 = vector.broadcast %cst_25 : f32 to vector<4x256xf32>
    %103 = arith.maximumf %101, %102 : vector<4x256xf32>
    %104 = vector.extract_strided_slice %8 {offsets = [8, 0], sizes = [4, 256], strides = [1, 1]} : vector<16x256xf32> to vector<4x256xf32>
    %105 = arith.addf %103, %104 : vector<4x256xf32>
    %106 = tpu.concatenate %34, %105, %34 in 1 : vector<4x17xf32>, vector<4x256xf32>, vector<4x17xf32> -> vector<4x290xf32>
    %107 = vector.extract_strided_slice %106 {offsets = [0, 0], sizes = [4, 256], strides = [1, 1]} : vector<4x290xf32> to vector<4x256xf32>
    %108 = vector.broadcast %29 : vector<1x256xf32> to vector<4x256xf32>
    %109 = arith.mulf %107, %108 : vector<4x256xf32>
    %110 = vector.extract_strided_slice %106 {offsets = [0, 1], sizes = [4, 256], strides = [1, 1]} : vector<4x290xf32> to vector<4x256xf32>
    %111 = vector.extract_strided_slice %106 {offsets = [0, 2], sizes = [4, 256], strides = [1, 1]} : vector<4x290xf32> to vector<4x256xf32>
    %112 = vector.broadcast %33 : vector<1x256xf32> to vector<4x256xf32>
    %113 = arith.mulf %111, %112 : vector<4x256xf32>
    %114 = vector.extract_strided_slice %106 {offsets = [0, 16], sizes = [4, 256], strides = [1, 1]} : vector<4x290xf32> to vector<4x256xf32>
    %115 = vector.broadcast %29 : vector<1x256xf32> to vector<4x256xf32>
    %116 = arith.mulf %114, %115 : vector<4x256xf32>
    %117 = vector.extract_strided_slice %106 {offsets = [0, 17], sizes = [4, 256], strides = [1, 1]} : vector<4x290xf32> to vector<4x256xf32>
    %118 = vector.extract_strided_slice %106 {offsets = [0, 18], sizes = [4, 256], strides = [1, 1]} : vector<4x290xf32> to vector<4x256xf32>
    %119 = vector.broadcast %33 : vector<1x256xf32> to vector<4x256xf32>
    %120 = arith.mulf %118, %119 : vector<4x256xf32>
    %121 = vector.extract_strided_slice %106 {offsets = [0, 32], sizes = [4, 256], strides = [1, 1]} : vector<4x290xf32> to vector<4x256xf32>
    %122 = vector.broadcast %29 : vector<1x256xf32> to vector<4x256xf32>
    %123 = arith.mulf %121, %122 : vector<4x256xf32>
    %124 = vector.extract_strided_slice %106 {offsets = [0, 33], sizes = [4, 256], strides = [1, 1]} : vector<4x290xf32> to vector<4x256xf32>
    %125 = vector.extract_strided_slice %106 {offsets = [0, 34], sizes = [4, 256], strides = [1, 1]} : vector<4x290xf32> to vector<4x256xf32>
    %126 = vector.broadcast %33 : vector<1x256xf32> to vector<4x256xf32>
    %127 = arith.mulf %125, %126 : vector<4x256xf32>
    %128 = tpu.concatenate %109, %110, %113, %116, %117, %120, %123, %124, %127 in 0 : vector<4x256xf32>, vector<4x256xf32>, vector<4x256xf32>, vector<4x256xf32>, vector<4x256xf32>, vector<4x256xf32>, vector<4x256xf32>, vector<4x256xf32>, vector<4x256xf32> -> vector<36x256xf32>
    %129 = arith.truncf %128 : vector<36x256xf32> to vector<36x256xbf16>
    %c2 = arith.constant 2 : index
    %c0_26 = arith.constant 0 : index
    %c0_27 = arith.constant 0 : index
    %130 = vector.load %arg4[%c2, %c0_26, %c0_27] : memref<3x4x36xbf16, #tpu.memory_space<vmem>>, vector<1x4x36xbf16>
    %131 = vector.shape_cast %130 : vector<1x4x36xbf16> to vector<4x36xbf16>
    %cst_28 = arith.constant dense<0.000000e+00> : vector<4x256xf32>
    %132 = tpu.matmul %131, %129, %cst_28 {dimension_numbers = #tpu.dot_dimension_numbers<[1], [0], [0], [1], [0, 0, 1, 1], [], []>} : vector<4x36xbf16>, vector<36x256xbf16>, vector<4x256xf32> -> vector<4x256xf32>
    %c2_29 = arith.constant 2 : index
    %c0_30 = arith.constant 0 : index
    %c0_31 = arith.constant 0 : index
    %133 = vector.load %arg5[%c2_29, %c0_30, %c0_31] : memref<3x4x1xf32, #tpu.memory_space<vmem>>, vector<1x4x1xf32>
    %134 = vector.shape_cast %133 : vector<1x4x1xf32> to vector<4x1xf32>
    %135 = vector.broadcast %134 : vector<4x1xf32> to vector<4x256xf32>
    %136 = arith.addf %132, %135 : vector<4x256xf32>
    %cst_32 = arith.constant 0.000000e+00 : f32
    %137 = vector.broadcast %cst_32 : f32 to vector<4x256xf32>
    %138 = arith.maximumf %136, %137 : vector<4x256xf32>
    %139 = vector.extract_strided_slice %8 {offsets = [12, 0], sizes = [4, 256], strides = [1, 1]} : vector<16x256xf32> to vector<4x256xf32>
    %140 = tpu.concatenate %68, %103, %138, %139 in 0 : vector<4x256xf32>, vector<4x256xf32>, vector<4x256xf32>, vector<4x256xf32> -> vector<16x256xf32>
    %c0_33 = arith.constant 0 : index
    %c0_34 = arith.constant 0 : index
    %141 = vector.load %arg6[%c0_33, %c0_34] : memref<32x16xbf16, #tpu.memory_space<vmem>>, vector<32x16xbf16>
    %142 = arith.truncf %140 : vector<16x256xf32> to vector<16x256xbf16>
    %cst_35 = arith.constant dense<0.000000e+00> : vector<32x256xf32>
    %143 = tpu.matmul %141, %142, %cst_35 {dimension_numbers = #tpu.dot_dimension_numbers<[1], [0], [0], [1], [0, 0, 1, 1], [], []>} : vector<32x16xbf16>, vector<16x256xbf16>, vector<32x256xf32> -> vector<32x256xf32>
    %c0_36 = arith.constant 0 : index
    %c0_37 = arith.constant 0 : index
    %144 = vector.load %arg7[%c0_36, %c0_37] : memref<32x1xf32, #tpu.memory_space<vmem>>, vector<32x1xf32>
    %145 = vector.broadcast %144 : vector<32x1xf32> to vector<32x256xf32>
    %146 = arith.addf %143, %145 : vector<32x256xf32>
    %147 = arith.addf %146, %0 : vector<32x256xf32>
    %cst_38 = arith.constant 0.000000e+00 : f32
    %148 = vector.broadcast %cst_38 : f32 to vector<32x256xf32>
    %149 = arith.maximumf %147, %148 : vector<32x256xf32>
    %c0_39 = arith.constant 0 : index
    %c0_40 = arith.constant 0 : index
    %150 = vector.load %arg8[%c0_39, %c0_40] : memref<32x256xf32, #tpu.memory_space<vmem>>, vector<32x256xf32>
    tpu.vector_store %arg8[%c0_39, %c0_40], %149 {strides = array<i32>} : memref<32x256xf32, #tpu.memory_space<vmem>>, vector<32x256xf32>,
    return
  }
  func.func @transform_0(%arg0: i32) -> (i32, i32) {
    %c0_i32 = arith.constant 0 : i32
    %c0_i32_0 = arith.constant 0 : i32
    return %arg0, %c0_i32 : i32, i32
  }
  func.func @transform_1(%arg0: i32) -> (i32, i32) {
    %c0_i32 = arith.constant 0 : i32
    %c0_i32_0 = arith.constant 0 : i32
    %c0_i32_1 = arith.constant 0 : i32
    return %c0_i32, %c0_i32_0 : i32, i32
  }
  func.func @transform_2(%arg0: i32) -> (i32, i32) {
    %c0_i32 = arith.constant 0 : i32
    %c0_i32_0 = arith.constant 0 : i32
    %c0_i32_1 = arith.constant 0 : i32
    return %c0_i32, %c0_i32_0 : i32, i32
  }
  func.func @transform_3(%arg0: i32) -> (i32, i32, i32) {
    %c0_i32 = arith.constant 0 : i32
    %c0_i32_0 = arith.constant 0 : i32
    %c0_i32_1 = arith.constant 0 : i32
    %c0_i32_2 = arith.constant 0 : i32
    return %c0_i32, %c0_i32_0, %c0_i32_1 : i32, i32, i32
  }
  func.func @transform_4(%arg0: i32) -> (i32, i32, i32) {
    %c0_i32 = arith.constant 0 : i32
    %c0_i32_0 = arith.constant 0 : i32
    %c0_i32_1 = arith.constant 0 : i32
    %c0_i32_2 = arith.constant 0 : i32
    return %c0_i32, %c0_i32_0, %c0_i32_1 : i32, i32, i32
  }
  func.func @transform_5(%arg0: i32) -> (i32, i32) {
    %c0_i32 = arith.constant 0 : i32
    %c0_i32_0 = arith.constant 0 : i32
    %c0_i32_1 = arith.constant 0 : i32
    return %c0_i32, %c0_i32_0 : i32, i32
  }
  func.func @transform_6(%arg0: i32) -> (i32, i32) {
    %c0_i32 = arith.constant 0 : i32
    %c0_i32_0 = arith.constant 0 : i32
    %c0_i32_1 = arith.constant 0 : i32
    return %c0_i32, %c0_i32_0 : i32, i32
  }
  func.func @transform_7(%arg0: i32) -> (i32, i32) {
    %c0_i32 = arith.constant 0 : i32
    %c0_i32_0 = arith.constant 0 : i32
    return %arg0, %c0_i32 : i32, i32
  }
}

</mosaic_0001>

<bundles_post_ra>
// kernel: tpu_custom_call.1
= control target key start
LH: loop header
LB: loop body
LE: loop exit
PB: predicated region body
PF: predicated region fallthrough
CT: control target
= control target key end

     0   :  { %12 = vsyncpa [#allocation3], 0  ;;  %s2376_s0 = inlined_call_operand.hbm [shape: f32[64,256], index: 0, kind: input, shape index: {}]   ;;  %s2377_s1 = inlined_call_operand.vmem [shape: bf16[16,32], index: 1, kind: input, shape index: {}]   ;;  %s2378_s2 = inlined_call_operand.vmem [shape: f32[16,1], index: 2, kind: input, shape index: {}]   ;;  %s2379_s3 = inlined_call_operand.vmem [shape: bf16[3,4,36], index: 3, kind: input, shape index: {}]   ;;  %s2380_s4 = inlined_call_operand.vmem [shape: f32[3,4,1], index: 4, kind: input, shape index: {}]   ;;  %s2381_s5 = inlined_call_operand.vmem [shape: bf16[32,16], index: 5, kind: input, shape index: {}]   ;;  %s2382_s6 = inlined_call_operand.vmem [shape: f32[32,1], index: 6, kind: input, shape index: {}]   ;;  %s2383_s7 = inlined_call_operand.hbm [shape: f32[64,256], index: 7, kind: output, shape index: {}]  }
   0x1   :  { %14 = vsyncpa [#allocation3 + $0x1], 0 }
   0x2   :  { %15 = vsyncpa [#allocation4], 0 }
   0x3   :  { %17 = vsyncpa [#allocation4 + $0x1], 0  ;;  %s1757_s24 = smov 0   ;;  %s1759_s25 = smov 0  }
   0x4   :  { %s1761_s26 = smov 0   ;;  %s1763_s27 = smov 0  }
   0x5 LB: > { %s1778_s28 = sadd.s32 4294967295, %s1694_s27   ;;  %s1339_s29 = sadd.s32 4294967294, %s1694_s27   ;;  %s1694_s27 = sphi %s1763_s27, %s2405_s27   ;;  %s1690_s26 = sphi %s1761_s26, %s2404_s26   ;;  %s1686_s25 = sphi %s1759_s25, %s2403_s25   ;;  %s1682_s24 = sphi %s1757_s24, %s2402_s24  }
   0x6   : > { %s1782_s30 = sadd.s32 1, %s1694_s27   ;;  %s30_s8 = sadd.s32 1, %s1690_s26 }
   0x7   : > { %s27_s9 = ssub.s32 %s1694_s27, %s1782_s30  ;;  %p37_p0 = scmp.ne.s32.totalorder %s1690_s26, %s1686_s25 }
   0x8   : > { %p28_p1 = scmp.eq.s32.totalorder %s27_s9, 0  ;;  %p38_p2 = scmp.eq.s32.totalorder %s1694_s27, 0 }
   0x9   : > { %p43_p3 = scmp.ne.s32.totalorder %s1686_s25, %s1682_s24  ;;  %p44_p4 = scmp.eq.s32.totalorder %s1778_s28, 0 }
   0xa   : > { %s1794_s10 = scalar_select %p28_p1, %s1690_s26, %s30_s8  }
   0xb   : > { %p1796_p5 = por %p38_p2, %p37_p0  ;;  %p1800_p6 = por %p44_p4, %p43_p3 }
   0xc   : > { %p193_p7 = scmp.eq.s32.totalorder %s1778_s28, 1  ;;  %p199_p8 = scmp.eq.s32.totalorder %s1339_s29, 1 }
   0xd   : > { %s2391_s12 = scalar_select %p1800_p6, 1, 0 }
   0xe   : > { %p1391_p10 = scmp.lt.s32.totalorder %s1694_s27, 2  ;;  %p1807_p11 = por %p193_p7, %p37_p0 }
   0xf   : > { %p1811_p12 = por %p199_p8, %p43_p3  ;;  %s237_s15 = sand.u32 1, %s1690_s26  }
  0x10   : > { %s2392_s13 = scalar_select %p1807_p11, 1, 0 }
  0x11   : > { %s2393_s14 = scalar_select %p1811_p12, 1, 0 }
  0x12   : > { %s1376_s16 = sshll.u32 %s1694_s27, 10  ;;  %s1342_s17 = sshll.u32 %s237_s15, 6 }
  0x13   : > { %s1820_s20 = scalar_lea.hbm %s2376_s0, %s1376_s16  ;;  %s241_s21 = scalar_lea.vmem [#allocation2], %s1342_s17 }
  0x14   : > { %s249_s22 = sshll.u32 %s241_s21, 4  ;;  %p1824_p13 = pnand %p1391_p10, %p1796_p5  ;;  %s1828_s22 = int_to_ptr.vmem [resolvable:$true] %s249_s22 }
  0x15   : > { %s1830_s29 = scalar_lea.sflag [#allocation3], %s237_s15  ;;  %s1602_s8 = scalar_lea.hbm %s1820_s20, 1024 }
  0x16   : > { %p1603_p0 = scmp.ne.s32.totalorder %s1820_s20, %s1602_s8  ;;  %p1604_p1 = pneg %p1824_p13 }
  0x17   : > { %s1607_s17 = scalar_lea.hbm %s2376_s0, 2048  ;;  %p1608_p4 = scmp.lt.s32.totalorder %s1820_s20, %s2376_s0 }
  0x18   : > { %p1605_p2 = pnand %p1604_p1, %p1603_p0  ;;  %p1609_p5 = scmp.lt.s32.totalorder %s1607_s17, %s1602_s8 }
  0x1a   : > { %p1606_p3 = pneg %p1605_p2  ;;  %p1610_p7 = por %p1609_p5, %p1608_p4 }
  0x1c   : > { %p1611_p8 = pnand %p1610_p7, %p1606_p3 }
  0x1e   : > { %1614 = shalt.err (!%p1611_p8)
}
  0x1f   : > { %s1615_s15 = scalar_lea.vmem %s1828_s22, 1024  ;;  %s1696_s19 = smov [#allocation2]  }
  0x20   : > { %p1616_p10 = scmp.ne.s32.totalorder %s1828_s22, %s1615_s15  ;;  %s1620_s21 = sshll.u32 %s1696_s19, 4  ;;  %s1621_s21 = int_to_ptr.vmem [resolvable:$false] %s1620_s21 }
  0x21   : > { %s1622_s9 = scalar_lea.vmem %s1621_s21, 2048  ;;  %p1623_p2 = scmp.lt.s32.totalorder %s1828_s22, %s1621_s21 }
  0x22   : > { %p1618_p9 = pnand %p1616_p10, %p1604_p1  ;;  %p1624_p12 = scmp.lt.s32.totalorder %s1622_s9, %s1615_s15 }
  0x24   : > { %p1619_p0 = pneg %p1618_p9  ;;  %p1625_p11 = por %p1624_p12, %p1623_p2 }
  0x26   : > { %p1626_p6 = pnand %p1625_p11, %p1619_p0 }
  0x28   : > { %1629 = shalt.err (!%p1626_p6)
}
  0x29   : > { %s1697_s8 = smov 256   ;;  %s1698_s16 = smov 16  }
  0x2a   : > { %1386 = dma.hbm_to_vmem [thread:$0]  (!%p1824_p13), %s1820_s20, 1024, %s1828_s22, %s1830_s29, %s1697_s8, %s1697_s8, %s1698_s16  }
  0x2b   : > { %p1346_p9 = scmp.ge.s32.totalorder %s1694_s27, 1  ;;  %p257_p1 = scmp.lt.s32.totalorder %s1694_s27, 3 }
  0x2d   : > { %p258_p3 = pnand %p1346_p9, %p257_p1 }
  0x2e   : > { %s1854_s17 = sand.u32 (!%p258_p3), 1, %s1686_s25   ;;  %p2395_p6 = scmp.ne.s32.totalorder (!%p258_p3), %s2391_s12, 0 }
  0x2f   : > { %261 = sbr.rel (%p258_p3) target bundleno = 1896 (0x768), region = 48  ;;  %s2387_s11 = sshll.u32 (!%p258_p3), %s1854_s17, 6 }
  0x30   : > { %s264_s18 = scalar_lea.sflag (!%p258_p3), [#allocation3], %s1854_s17  ;;  %s1860_s15 = scalar_lea.vmem (!%p258_p3), [#allocation2], %s2387_s11 }
  0x34   : > { %1673 = dma.done.wait (%p2395_p6), %s264_s18, 1024  }
  0x35   : > { %1675 = vsyncadd (%p2395_p6), %s264_s18, 4294966272  ;;  %v1699_v0 = vmov 0   ;;  %v306_v1 = vld [vmem:[%s1860_s15 + $0x28] sm:$0xff]  ;;  %v308_v2 = vld [vmem:[%s1860_s15 + $0x38] sm:$0xff]  ;;  %vm332_vm0 = vcmask 261120   ;;  %v383_v15 = vlaneseq  ;;  %v1700_v20 = vmov 0.0  }
  0x36   : > { %368 = vmatprep.mubr.bf16.mxu1 %v1699_v0  ;;  %1444 = vset.pattern.permute.xlu0 %v1699_v0  ;;  %v305_v3 = vld [vmem:[%s1860_s15 + $0x20] sm:$0xff]  ;;  %v314_v4 = vpack.c.bf16 %v308_v2, %v306_v1  ;;  %v307_v5 = vld [vmem:[%s1860_s15 + $0x30] sm:$0xff]  ;;  %v302_v6 = vld [vmem:[%s1860_s15 + $0x8] sm:$0xff]  ;;  %s1701_s29 = smov 34   ;;  %s1702_s19 = smov 17   ;;  %vm428_vm5 = vcmask 138240  }
  0x37   : > { %1550 = vset.pattern.permute.xlu1 %v1699_v0  ;;  %895 = vmatprep.mubr.bf16.mxu0 %v1699_v0  ;;  %v304_v7 = vld [vmem:[%s1860_s15 + $0x18] sm:$0xff]  ;;  %v313_v8 = vpack.c.bf16 %v307_v5, %v305_v3  ;;  %v301_v10 = vld [vmem:[%s1860_s15] sm:$0xff]  ;;  %v303_v11 = vld [vmem:[%s1860_s15 + $0x10] sm:$0xff]  ;;  %v384_v16 = vand.u32 127, %v383_v15  ;;  %s1703_s21 = smov 18   ;;  %s1704_s9 = smov 32  }
  0x38   : > { %v312_v9 = vpack.c.bf16 %v304_v7, %v302_v6  ;;  %348 = vmatprep.subr.bf16.mxu1 %v314_v4  ;;  %v315_v12 = vld [vmem:[%s2378_s2] sm:$0xff]  ;;  %v311_v13 = vpack.c.bf16 %v303_v11, %v301_v10  ;;  %s2386_s8 = smov 16   ;;  %s1706_s16 = smov 2   ;;  %vm492_vm6 = vcmask 277504   ;;  %vm469_vm7 = vcmask 146432  }
  0x39   : > { %349 = vmatpush1.bf16.msra.mxu1 %v313_v8  ;;  %319 = vperm.xlu0 %1444, %v315_v12   ;;  %v1591_v14 = vld [vmem:[%s2377_s1] sm:$0xff]   ;;  %v385_v17 = vadd.s32 128, %v384_v16  ;;  %v390_v18 = vand.u32 15, %v384_v16  ;;  %s1707_s18 = smov 111   ;;  %s1708_s12 = smov 95   ;;  %vm443_vm8 = vcmask 15360  }
  0x3a   : > { %350 = vmatprep.subr.bf16.mxu1 %v312_v9  ;;  %s1709_s20 = smov 94   ;;  %s1710_s22 = smov 96   ;;  %vm457_vm9 = vcmask 130048   ;;  %vm609_vm10 = vcmask 769024   ;;  %vm640_vm11 = vcmask 1041408   ;;  %vm553_vm12 = vcmask 908288  }
  0x3b   : > { %v397_v19 = vand.u32 15, %v385_v17  ;;  %vm416_vm1 = vcmp.le.s32.totalorder %v390_v18, 14  ;;  %vm410_vm3 = vcmp.ge.s32.totalorder %v390_v18, 1  ;;  %s2388_s23 = smov 110   ;;  %vm584_vm13 = vcmask 785408   ;;  %s1378_s11 = sshll.u32 %s1778_s28, 10 }
  0x3c   : > { %v1353_v21 = vsel %vm416_vm1, 1.0, %v1700_v20  ;;  %v1886_v24 = vsel %vm410_vm3, 1.0, %v1700_v20  ;;  %vm595_vm14 = vcmask 777216   ;;  %vm525_vm15 = vcmask 1031168   ;;  %p2398_p12 = scmp.ne.s32.totalorder %s2392_s13, 0  ;;  %s1715_s28 = smov [#allocation5]  }
  0x3d   : > { %351 = vmatpush1.bf16.msra.mxu1 %v311_v13  ;;  %vm417_vm2 = vcmp.le.s32.totalorder %v397_v19, 14  ;;  %vm411_vm4 = vcmp.ge.s32.totalorder %v397_v19, 1  ;;  %vm570_vm1 = vcmask 900096   ;;  %vm614_vm3 = vcmask 1043456  }
  0x3e   : > { %v1354_v22 = vsel %vm417_vm2, 1.0, %v1700_v20  ;;  %v1888_v25 = vsel %vm411_vm4, 1.0, %v1700_v20  ;;  %vm542_vm2 = vcmask 916480   ;;  %vm636_vm4 = vcmask 293888  }
  0x3f   : > { %v1445_v23 = vpack.i.bf16 %v1354_v22, %v1353_v21  ;;  %v1455_v33 = vpack.i.bf16 %v1888_v25, %v1886_v24 }
  0x40   : > { %1350 = vmatmul.mubr.msk.bf16.vlgmr.msra.gmra.mxu1 %vm332_vm0, %v1591_v14 }
  0x41   : > { %679 = vmatprep.mubr.bf16.mxu1 %v1699_v0  ;;  %1446 = vrot.lane.b32.xlu1 %v1445_v23, %s1701_s29  ;;  %s1712_s29 = smov 126  }
  0xb3   : > { %v1447_v34 = vpop.permute.xlu1 %1446 }
  0xb4   : > { %v320_v26 = vpop.permute.xlu0 %319  ;;  %v1905_v36 = vunpack.i.h.bf16 %v1447_v34  ;;  %v1907_v37 = vunpack.i.l.bf16 %v1447_v34 }
  0xb6   : > { %v1927_v46 = vsel %vm492_vm6, %v1907_v37, %v1905_v36 }
 0x100   : > { %v370_v27 = vpop.f32.mrf.mxu1 }
 0x101   : > { %v1890_v28 = vadd.f32 %v370_v27, %v320_v26 }
 0x102   : > { %v372_v29 = vpop.f32.mrf.mxu1 }
 0x103   : > { %v379_v30 = vmax.f32 %v1890_v28, 0.0  ;;  %v1893_v31 = vadd.f32 %v372_v29, %v320_v26 }
 0x105   : > { %v380_v32 = vmax.f32 %v1893_v31, 0.0  ;;  %424 = vrot.lane.b32.xlu0 %v379_v30, %s1702_s19 }
 0x107   : > { %426 = vrot.lane.b32.xlu1 %v380_v32, %s1702_s19 }
 0x109   : > { %1451 = vrot.lane.b32.xlu0 %v1445_v23, %s1703_s21  ;;  %s1713_s21 = smov 127  }
 0x10b   : > { %1456 = vrot.lane.b32.xlu1 %v1455_v33, %s1704_s9  ;;  %s1714_s9 = smov 112  }
 0x10d   : > { %1461 = vrot.lane.b32.xlu0 %v1455_v33, %s2386_s8  ;;  %v630_v33 = vld [vmem:[%s2380_s4] sm:$0xf]  ;;  %s2397_s8 = sshll.u32 %s1854_s17, 6 }
 0x10f   : > { %1466 = vrot.lane.b32.xlu1 %v1445_v23, %s1706_s16  ;;  %s2309_s16 = scalar_lea.vmem [#allocation5], %s2397_s8 }
 0x177   : > { %v425_v35 = vpop.permute.xlu0 %424 }
 0x178   : > { %v1910_v38 = vsel %vm428_vm5, 0.0, %v425_v35 }
 0x179   : > { %v427_v39 = vpop.permute.xlu1 %426  ;;  %547 = vrot.lane.b32.xlu0 %v1910_v38, %s1707_s18  ;;  %v502_v40 = vrot.slane %v1910_v38, 4  ;;  %v497_v57 = vmul.f32 %v1907_v37, %v1910_v38 }
 0x17a   : > { %v1916_v41 = vsel %vm428_vm5, %v425_v35, %v427_v39  ;;  %v434_v42 = vsel %vm428_vm5, %v427_v39, 0.0 }
 0x17b   : > { %589 = vrot.lane.b32.xlu1 %v502_v40, %s1708_s12  ;;  %v1452_v43 = vpop.permute.xlu0 %1451  ;;  %v1470_v44 = vpack.i.bf16 %v434_v42, %v1916_v41  ;;  %v499_v48 = vmul.f32 %v1905_v36, %v434_v42  ;;  %v503_v49 = vrot.slane %v1916_v41, 4  ;;  %v504_v50 = vrot.slane %v434_v42, 4 }
 0x17c   : > { %v1923_v45 = vunpack.i.l.bf16 %v1452_v43  ;;  %v1932_v51 = vunpack.i.h.bf16 %v1452_v43  ;;  %v498_v55 = vmul.f32 %v1927_v46, %v1916_v41 }
 0x17d   : > { %v1457_v47 = vpop.permute.xlu1 %1456  ;;  %1471 = vrot.lane.b32.xlu0 %v1470_v44, %s1707_s18  ;;  %v1485_v62 = vpack.i.bf16 %v504_v50, %v503_v49 }
 0x17e   : > { %v1934_v52 = vunpack.i.h.bf16 %v1457_v47  ;;  %v1936_v53 = vunpack.i.l.bf16 %v1457_v47  ;;  %v474_v58 = vmul.f32 %v1923_v45, %v1910_v38  ;;  %v1963_v3 = vsel %vm469_vm7, %v1923_v45, %v1932_v51 }
 0x17f   : > { %607 = vrot.lane.b32.xlu1 %v499_v48, %s1709_s20  ;;  %v1462_v54 = vpop.permute.xlu0 %1461  ;;  %v1475_v4 = vpack.i.bf16 %v498_v55, %v497_v57  ;;  %v476_v5 = vmul.f32 %v1932_v51, %v434_v42  ;;  %v475_v12 = vmul.f32 %v1963_v3, %v1916_v41 }
 0x180   : > { %v485_v56 = vmul.f32 %v1936_v53, %v1910_v38  ;;  %v1947_v59 = vunpack.i.h.bf16 %v1462_v54  ;;  %v1949_v60 = vunpack.i.l.bf16 %v1462_v54  ;;  %v1954_v63 = vsel %vm332_vm0, %v1936_v53, %v1934_v52 }
 0x181   : > { %v1467_v61 = vpop.permute.xlu1 %1466  ;;  %v561_v6 = vrot.slane %v474_v58, 4  ;;  %v486_v7 = vmul.f32 %v1954_v63, %v1916_v41  ;;  %v487_v8 = vmul.f32 %v1934_v52, %v434_v42  ;;  %v562_v18 = vrot.slane %v475_v12, 4 }
 0x182   : > { %v1956_v1 = vunpack.i.h.bf16 %v1467_v61  ;;  %v1958_v2 = vunpack.i.l.bf16 %v1467_v61  ;;  %578 = vrot.lane.b32.xlu0 %v485_v56, %s1710_s22  ;;  %v1983_v13 = vsel %vm457_vm9, %v1949_v60, %v1947_v59  ;;  %v464_v16 = vmul.f32 %v1947_v59, %v434_v42 }
 0x183   : > { %1486 = vrot.lane.b32.xlu1 %v1485_v62, %s1708_s12  ;;  %v1480_v14 = vpack.i.bf16 %v487_v8, %v486_v7  ;;  %v463_v15 = vmul.f32 %v1983_v13, %v1916_v41  ;;  %v563_v19 = vrot.slane %v476_v5, 4  ;;  %v462_v26 = vmul.f32 %v1949_v60, %v1910_v38 }
 0x184   : > { %v1973_v9 = vsel %vm443_vm8, %v1958_v2, %v1956_v1  ;;  %v450_v11 = vmul.f32 %v1956_v1, %v434_v42  ;;  %v535_v21 = vrot.slane %v464_v16, 4  ;;  %v448_v27 = vmul.f32 %v1958_v2, %v1910_v38 }
 0x185   : > { %v449_v10 = vmul.f32 %v1973_v9, %v1916_v41  ;;  %v534_v20 = vrot.slane %v463_v15, 4  ;;  %v1500_v22 = vpack.i.bf16 %v563_v19, %v562_v18  ;;  %v533_v29 = vrot.slane %v462_v26, 4 }
 0x186   : > { %1476 = vrot.lane.b32.xlu0 %v1475_v4, %s1709_s20  ;;  %vm511_vm0 = vcmask 1039360  }
 0x187   : > { %564 = vrot.lane.b32.xlu1 %v561_v6, %s2388_s23  ;;  %v1495_v17 = vpack.i.bf16 %v450_v11, %v449_v10  ;;  %v1505_v23 = vpack.i.bf16 %v535_v21, %v534_v20 }
 0x18a   : > { %1481 = vrot.lane.b32.xlu0 %v1480_v14, %s1710_s22 }
 0x18b   : > { %1496 = vrot.lane.b32.xlu1 %v1495_v17, %s1712_s29 }
 0x18e   : > { %1491 = vrot.lane.b32.xlu0 %v1485_v62, %s1713_s21 }
 0x18f   : > { %1501 = vrot.lane.b32.xlu1 %v1500_v22, %s2388_s23 }
 0x192   : > { %1506 = vrot.lane.b32.xlu0 %v1505_v23, %s1714_s9 }
 0x193   : > { %505 = vrot.lane.b32.xlu1 %v502_v40, %s1713_s21 }
 0x196   : > { %519 = vrot.lane.b32.xlu0 %v448_v27, %s1712_s29 }
 0x197   : > { %536 = vrot.lane.b32.xlu1 %v533_v29, %s1714_s9 }
 0x19a   : > { %633 = vperm.xlu0 %1444, %v630_v33  }
 0x1eb   : > { %v548_v34 = vpop.permute.xlu0 %547 }
 0x1ed   : > { %v590_v35 = vpop.permute.xlu1 %589 }
 0x1ef   : > { %v1472_v39 = vpop.permute.xlu0 %1471 }
 0x1f0   : > { %v1473_v58 = vunpack.i.l.bf16 %v1472_v39  ;;  %v1474_v5 = vunpack.i.h.bf16 %v1472_v39 }
 0x1f1   : > { %v608_v42 = vpop.permute.xlu1 %607 }
 0x1f2   : > { %v554_v12 = vsel %vm553_vm12, %v548_v34, %v1473_v58  ;;  %v555_v18 = vsel %vm553_vm12, %v1473_v58, %v1474_v5 }
 0x1f4   : > { %v579_v43 = vpop.permute.xlu0 %578 }
 0x1f5   : > { %v1487_v44 = vpop.permute.xlu1 %1486 }
 0x1f6   : > { %v1489_v6 = vunpack.i.h.bf16 %v1487_v44  ;;  %v1488_v7 = vunpack.i.l.bf16 %v1487_v44 }
 0x1f8   : > { %v1477_v40 = vpop.permute.xlu0 %1476  ;;  %v597_v19 = vsel %vm595_vm14, %v1488_v7, %v1489_v6  ;;  %v596_v22 = vsel %vm595_vm14, %v590_v35, %v1488_v7 }
 0x1f9   : > { %v1479_v47 = vunpack.i.h.bf16 %v1477_v40  ;;  %v1478_v48 = vunpack.i.l.bf16 %v1477_v40  ;;  %v565_v49 = vpop.permute.xlu1 %564 }
 0x1fb   : > { %v611_v50 = vsel %vm609_vm10, %v1479_v47, %v608_v42  ;;  %v610_v54 = vsel %vm609_vm10, %v1478_v48, %v1479_v47 }
 0x1fc   : > { %v628_v55 = vpack.c.bf16 %v611_v50, %v611_v50  ;;  %v1482_v56 = vpop.permute.xlu0 %1481  ;;  %v627_v57 = vpack.c.bf16 %v610_v54, %v610_v54  ;;  %v436_v54 = vmul.f32 %v1888_v25, %v1916_v41 }
 0x1fd   : > { %v1484_v61 = vunpack.i.h.bf16 %v1482_v56  ;;  %v1483_v62 = vunpack.i.l.bf16 %v1482_v56  ;;  %v1497_v4 = vpop.permute.xlu1 %1496 }
 0x1fe   : > { %1355 = vmatprep.subr.msk.bf16.mxu1 %vm640_vm11, %v628_v55  ;;  %v642_v8 = vsel %vm640_vm11, %v627_v57, 0  ;;  %v1499_v23 = vunpack.i.h.bf16 %v1497_v4  ;;  %v1498_v26 = vunpack.i.l.bf16 %v1497_v4 }
 0x1ff   : > { %658 = vmatpush1.bf16.msra.mxu1 %v642_v8  ;;  %v586_v10 = vsel %vm584_vm13, %v1483_v62, %v1484_v61  ;;  %v585_v14 = vsel %vm584_vm13, %v579_v43, %v1483_v62  ;;  %v435_v62 = vmul.f32 %v1886_v24, %v1910_v38  ;;  %v2042_v38 = vpop.f32.mrf.mxu1 }
 0x200   : > { %v1492_v11 = vpop.permute.xlu0 %1491  ;;  %v622_v27 = vsel %vm614_vm3, %v586_v10, %v597_v19  ;;  %v621_v42 = vsel %vm614_vm3, %v585_v14, %v596_v22  ;;  %v527_v55 = vsel %vm525_vm15, %v1498_v26, %v1499_v23  ;;  %v691_v22 = vrot.slane %v380_v32, 4 }
 0x201   : > { %v1494_v15 = vunpack.i.h.bf16 %v1492_v11  ;;  %v1493_v16 = vunpack.i.l.bf16 %v1492_v11  ;;  %v1502_v17 = vpop.permute.xlu1 %1501  ;;  %v629_v11 = vld [vmem:[%s2379_s3] sm:$0x3] }
 0x202   : > { %v1504_v20 = vunpack.i.h.bf16 %v1502_v17  ;;  %v1503_v21 = vunpack.i.l.bf16 %v1502_v17 }
 0x203   : > { %v513_v29 = vsel %vm511_vm0, %v1493_v16, %v1494_v15 }
 0x204   : > { %v571_v33 = vsel %vm570_vm1, %v565_v49, %v1503_v21  ;;  %v572_v34 = vsel %vm570_vm1, %v1503_v21, %v1504_v20  ;;  %v1507_v39 = vpop.permute.xlu0 %1506  ;;  %v616_v58 = vsel %vm614_vm3, %v436_v54, %v513_v29 }
 0x205   : > { %v1509_v43 = vunpack.i.h.bf16 %v1507_v39  ;;  %v1508_v44 = vunpack.i.l.bf16 %v1507_v39  ;;  %v506_v40 = vpop.permute.xlu1 %505  ;;  %v620_v47 = vsel %vm614_vm3, %v555_v18, %v572_v34  ;;  %v619_v35 = vsel %vm614_vm3, %v554_v12, %v571_v33  ;;  %v2044_v12 = vpop.f32.mrf.mxu1 }
 0x206   : > { %v626_v48 = vpack.c.bf16 %v622_v27, %v620_v47  ;;  %v625_v50 = vpack.c.bf16 %v621_v42, %v619_v35  ;;  %v512_v56 = vsel %vm511_vm0, %v506_v40, %v1493_v16  ;;  %v690_v18 = vrot.slane %v379_v30, 4 }
 0x207   : > { %v544_v49 = vsel %vm542_vm2, %v1508_v44, %v1509_v43  ;;  %v615_v7 = vsel %vm614_vm3, %v435_v62, %v512_v56 }
 0x208   : > { %v520_v57 = vpop.permute.xlu0 %519  ;;  %659 = vmatprep.subr.bf16.mxu1 %v626_v48  ;;  %v618_v61 = vsel %vm614_vm3, %v527_v55, %v544_v49 }
 0x209   : > { %v526_v4 = vsel %vm525_vm15, %v520_v57, %v1498_v26  ;;  %v537_v5 = vpop.permute.xlu1 %536  ;;  %660 = vmatpush1.bf16.msra.mxu1 %v625_v50  ;;  %v624_v41 = vpack.c.bf16 %v618_v61, %v616_v58 }
 0x20a   : > { %v543_v6 = vsel %vm542_vm2, %v537_v5, %v1508_v44 }
 0x20b   : > { %v617_v8 = vsel %vm614_vm3, %v526_v4, %v543_v6  ;;  %661 = vmatprep.subr.bf16.mxu1 %v624_v41 }
 0x20c   : > { %v623_v10 = vpack.c.bf16 %v617_v8, %v615_v7 }
 0x20e   : > { %662 = vmatpush1.bf16.msra.mxu1 %v623_v10 }
 0x211   : > { %1356 = vmatmul.mubr.msk.bf16.vlgmr.msra.gmra.mxu1 %vm636_vm4, %v629_v11 }
 0x212   : > { %1107 = vmatprep.mubr.bf16.mxu1 %v1699_v0 }
 0x215   : > { %v634_v14 = vpop.permute.xlu0 %633 }
 0x2d1   : > { %v681_v15 = vpop.f32.mrf.mxu1 }
 0x2d2   : > { %v2046_v16 = vadd.f32 %v681_v15, %v634_v14 }
 0x2d3   : > { %v683_v17 = vpop.f32.mrf.mxu1 }
 0x2d4   : > { %v688_v19 = vmax.f32 %v2046_v16, 0.0  ;;  %v2051_v20 = vadd.f32 %v683_v17, %v634_v14 }
 0x2d5   : > { %v685_v21 = vpop.f32.mrf.mxu1 }
 0x2d6   : > { %v694_v23 = vadd.f32 %v690_v18, %v688_v19  ;;  %v689_v26 = vmax.f32 %v2051_v20, 0.0  ;;  %v1593_v20 = vld [vmem:[%s2381_s5 + $0x8] sm:$0xff]  }
 0x2d7   : > { %v686_v27 = vpop.f32.mrf.mxu1 }
 0x2d8   : > { %v695_v29 = vadd.f32 %v691_v22, %v689_v26  ;;  %698 = vrot.lane.b32.xlu1 %v694_v23, %s1702_s19  ;;  %v316_v22 = vld [vmem:[%s2378_s2 + $0x8] sm:$0xff]  ;;  %v1358_v23 = vld [vmem:[%s2380_s4 + $0x4] sm:$0xf] }
 0x2da   : > { %700 = vrot.lane.b32.xlu0 %v695_v29, %s1702_s19 }
 0x34a   : > { %v699_v28 = vpop.permute.xlu1 %698 }
 0x34b   : > { %v2063_v30 = vsel %vm428_vm5, 0.0, %v699_v28 }
 0x34c   : > { %v701_v33 = vpop.permute.xlu0 %700  ;;  %769 = vrot.lane.b32.xlu1 %v2063_v30, %s1707_s18  ;;  %v727_v31 = vrot.slane %v2063_v30, 4  ;;  %v719_v40 = vmul.f32 %v1936_v53, %v2063_v30  ;;  %v716_v35 = vmul.f32 %v1923_v45, %v2063_v30  ;;  %v722_v50 = vmul.f32 %v1907_v37, %v2063_v30 }
 0x34d   : > { %v2069_v32 = vsel %vm428_vm5, %v699_v28, %v701_v33  ;;  %v707_v34 = vsel %vm428_vm5, %v701_v33, 0.0  ;;  %v713_v17 = vmul.f32 %v1949_v60, %v2063_v30  ;;  %v710_v18 = vmul.f32 %v1958_v2, %v2063_v30 }
 0x34e   : > { %808 = vrot.lane.b32.xlu0 %v727_v31, %s1708_s12  ;;  %v1510_v39 = vpack.i.bf16 %v707_v34, %v2069_v32  ;;  %v724_v42 = vmul.f32 %v1905_v36, %v707_v34  ;;  %v728_v43 = vrot.slane %v2069_v32, 4  ;;  %v729_v44 = vrot.slane %v707_v34, 4 }
 0x34f   : > { %v723_v47 = vmul.f32 %v2069_v32, %v1927_v46  ;;  %v720_v55 = vmul.f32 %v2069_v32, %v1954_v63  ;;  %v721_v49 = vmul.f32 %v1934_v52, %v707_v34  ;;  %v782_v56 = vrot.slane %v716_v35, 4 }
 0x350   : > { %1511 = vrot.lane.b32.xlu1 %v1510_v39, %s1707_s18  ;;  %v1525_v48 = vpack.i.bf16 %v729_v44, %v728_v43  ;;  %v711_v57 = vmul.f32 %v2069_v32, %v1973_v9  ;;  %v712_v58 = vmul.f32 %v1956_v1, %v707_v34  ;;  %v717_v61 = vmul.f32 %v2069_v32, %v1963_v3 }
 0x351   : > { %v1515_v54 = vpack.i.bf16 %v723_v47, %v722_v50  ;;  %v718_v62 = vmul.f32 %v1932_v51, %v707_v34  ;;  %v1520_v4 = vpack.i.bf16 %v721_v49, %v720_v55  ;;  %v714_v5 = vmul.f32 %v2069_v32, %v1983_v13 }
 0x352   : > { %825 = vrot.lane.b32.xlu0 %v724_v42, %s1709_s20  ;;  %v715_v41 = vmul.f32 %v1947_v59, %v707_v34  ;;  %v1535_v6 = vpack.i.bf16 %v712_v58, %v711_v57  ;;  %v783_v7 = vrot.slane %v717_v61, 4  ;;  %v756_v21 = vrot.slane %v713_v17, 4 }
 0x353   : > { %v784_v8 = vrot.slane %v718_v62, 4  ;;  %v757_v10 = vrot.slane %v714_v5, 4 }
 0x354   : > { %798 = vrot.lane.b32.xlu1 %v719_v40, %s1710_s22  ;;  %v758_v11 = vrot.slane %v715_v41, 4 }
 0x355   : > { %v1540_v14 = vpack.i.bf16 %v784_v8, %v783_v7 }
 0x356   : > { %1526 = vrot.lane.b32.xlu0 %v1525_v48, %s1708_s12  ;;  %v1545_v15 = vpack.i.bf16 %v758_v11, %v757_v10  ;;  %v709_v11 = vmul.f32 %v1888_v25, %v2069_v32 }
 0x358   : > { %1516 = vrot.lane.b32.xlu1 %v1515_v54, %s1709_s20 }
 0x35a   : > { %785 = vrot.lane.b32.xlu0 %v782_v56, %s2388_s23 }
 0x35c   : > { %1521 = vrot.lane.b32.xlu1 %v1520_v4, %s1710_s22 }
 0x35e   : > { %1536 = vrot.lane.b32.xlu0 %v1535_v6, %s1712_s29 }
 0x360   : > { %1531 = vrot.lane.b32.xlu1 %v1525_v48, %s1713_s21 }
 0x362   : > { %1541 = vrot.lane.b32.xlu0 %v1540_v14, %s2388_s23 }
 0x364   : > { %1546 = vrot.lane.b32.xlu1 %v1545_v15, %s1714_s9 }
 0x366   : > { %730 = vrot.lane.b32.xlu0 %v727_v31, %s1713_s21 }
 0x368   : > { %743 = vrot.lane.b32.xlu1 %v710_v18, %s1712_s29 }
 0x36a   : > { %759 = vrot.lane.b32.xlu0 %v756_v21, %s1714_s9 }
 0x36c   : > { %324 = vperm.xlu1 %1550, %v316_v22  }
 0x36e   : > { %851 = vperm.xlu0 %1444, %v1358_v23  }
 0x3be   : > { %v770_v27 = vpop.permute.xlu1 %769 }
 0x3c0   : > { %v809_v29 = vpop.permute.xlu0 %808 }
 0x3c2   : > { %v1512_v28 = vpop.permute.xlu1 %1511 }
 0x3c3   : > { %v1513_v54 = vunpack.i.l.bf16 %v1512_v28  ;;  %v1514_v58 = vunpack.i.h.bf16 %v1512_v28 }
 0x3c4   : > { %v826_v33 = vpop.permute.xlu0 %825 }
 0x3c5   : > { %v775_v6 = vsel %vm553_vm12, %v770_v27, %v1513_v54  ;;  %v776_v21 = vsel %vm553_vm12, %v1513_v54, %v1514_v58 }
 0x3c6   : > { %v799_v31 = vpop.permute.xlu1 %798 }
 0x3c8   : > { %v1527_v34 = vpop.permute.xlu0 %1526 }
 0x3c9   : > { %v1529_v61 = vunpack.i.h.bf16 %v1527_v34  ;;  %v1528_v62 = vunpack.i.l.bf16 %v1527_v34 }
 0x3ca   : > { %v1517_v39 = vpop.permute.xlu1 %1516 }
 0x3cb   : > { %v1519_v42 = vunpack.i.h.bf16 %v1517_v39  ;;  %v1518_v43 = vunpack.i.l.bf16 %v1517_v39  ;;  %v814_v22 = vsel %vm595_vm14, %v809_v29, %v1528_v62  ;;  %v815_v23 = vsel %vm595_vm14, %v1528_v62, %v1529_v61 }
 0x3cc   : > { %v786_v44 = vpop.permute.xlu0 %785 }
 0x3cd   : > { %v828_v40 = vsel %vm609_vm10, %v1519_v42, %v826_v33  ;;  %v827_v47 = vsel %vm609_vm10, %v1518_v43, %v1519_v42 }
 0x3ce   : > { %v1522_v35 = vpop.permute.xlu1 %1521  ;;  %v844_v48 = vpack.c.bf16 %v828_v40, %v828_v40  ;;  %v843_v50 = vpack.c.bf16 %v827_v47, %v827_v47 }
 0x3cf   : > { %v1524_v55 = vunpack.i.h.bf16 %v1522_v35  ;;  %v1523_v49 = vunpack.i.l.bf16 %v1522_v35 }
 0x3d0   : > { %1359 = vmatprep.subr.msk.bf16.mxu0 %vm640_vm11, %v844_v48  ;;  %v1537_v56 = vpop.permute.xlu0 %1536  ;;  %v858_v57 = vsel %vm640_vm11, %v843_v50, 0 }
 0x3d1   : > { %874 = vmatpush1.bf16.msra.mxu0 %v858_v57  ;;  %v804_v7 = vsel %vm584_vm13, %v799_v31, %v1523_v49  ;;  %v805_v8 = vsel %vm584_vm13, %v1523_v49, %v1524_v55  ;;  %v1539_v14 = vunpack.i.h.bf16 %v1537_v56  ;;  %v1538_v15 = vunpack.i.l.bf16 %v1537_v56 }
 0x3d2   : > { %v1532_v4 = vpop.permute.xlu1 %1531  ;;  %v838_v43 = vsel %vm614_vm3, %v805_v8, %v815_v23  ;;  %v837_v29 = vsel %vm614_vm3, %v804_v7, %v814_v22  ;;  %v708_v57 = vmul.f32 %v1886_v24, %v2063_v30 }
 0x3d3   : > { %v1534_v5 = vunpack.i.h.bf16 %v1532_v4  ;;  %v1533_v41 = vunpack.i.l.bf16 %v1532_v4  ;;  %v750_v47 = vsel %vm525_vm15, %v1538_v15, %v1539_v14 }
 0x3d4   : > { %v1542_v10 = vpop.permute.xlu0 %1541 }
 0x3d5   : > { %v1544_v17 = vunpack.i.h.bf16 %v1542_v10  ;;  %v1543_v18 = vunpack.i.l.bf16 %v1542_v10  ;;  %v737_v27 = vsel %vm511_vm0, %v1533_v41, %v1534_v5 }
 0x3d6   : > { %v1547_v28 = vpop.permute.xlu1 %1546  ;;  %v832_v54 = vsel %vm614_vm3, %v709_v11, %v737_v27 }
 0x3d7   : > { %v791_v33 = vsel %vm570_vm1, %v786_v44, %v1543_v18  ;;  %v792_v31 = vsel %vm570_vm1, %v1543_v18, %v1544_v17  ;;  %v1549_v34 = vunpack.i.h.bf16 %v1547_v28  ;;  %v1548_v39 = vunpack.i.l.bf16 %v1547_v28 }
 0x3d8   : > { %v731_v32 = vpop.permute.xlu0 %730  ;;  %v836_v42 = vsel %vm614_vm3, %v776_v21, %v792_v31  ;;  %v835_v40 = vsel %vm614_vm3, %v775_v6, %v791_v33 }
 0x3d9   : > { %v766_v35 = vsel %vm542_vm2, %v1548_v39, %v1549_v34  ;;  %v842_v48 = vpack.c.bf16 %v838_v43, %v836_v42  ;;  %v841_v50 = vpack.c.bf16 %v837_v29, %v835_v40  ;;  %v736_v49 = vsel %vm511_vm0, %v731_v32, %v1533_v41  ;;  %v1357_v41 = vld [vmem:[%s2379_s3 + $0x2] sm:$0x3] }
 0x3da   : > { %v744_v44 = vpop.permute.xlu1 %743  ;;  %v834_v55 = vsel %vm614_vm3, %v750_v47, %v766_v35  ;;  %v831_v4 = vsel %vm614_vm3, %v708_v57, %v736_v49 }
 0x3db   : > { %875 = vmatprep.subr.bf16.mxu0 %v842_v48  ;;  %v840_v56 = vpack.c.bf16 %v834_v55, %v832_v54  ;;  %v749_v61 = vsel %vm525_vm15, %v744_v44, %v1538_v15 }
 0x3dc   : > { %v760_v58 = vpop.permute.xlu0 %759  ;;  %876 = vmatpush1.bf16.msra.mxu0 %v841_v50 }
 0x3dd   : > { %v765_v62 = vsel %vm542_vm2, %v760_v58, %v1548_v39  ;;  %877 = vmatprep.subr.bf16.mxu0 %v840_v56 }
 0x3de   : > { %v833_v5 = vsel %vm614_vm3, %v749_v61, %v765_v62 }
 0x3df   : > { %v839_v6 = vpack.c.bf16 %v833_v5, %v831_v4  ;;  %v1362_v5 = vld [vmem:[%s2380_s4 + $0x8] sm:$0xf] }
 0x3e1   : > { %878 = vmatpush1.bf16.msra.mxu0 %v839_v6  ;;  %v1134_v6 = vld [vmem:[%s2382_s6] sm:$0xff] }
 0x3e4   : > { %1360 = vmatmul.mubr.msk.bf16.vlgmr.msra.gmra.mxu0 %vm636_vm4, %v1357_v41  ;;  %v1137_v41 = vld [vmem:[%s2382_s6 + $0x18] sm:$0xff] }
 0x3e5   : > { %1206 = vmatprep.mubr.bf16.mxu0 %v1699_v0 }
 0x3e7   : > { %v325_v30 = vpop.permute.xlu1 %324 }
 0x3e8   : > { %v2156_v7 = vadd.f32 %v2042_v38, %v325_v30  ;;  %v2159_v11 = vadd.f32 %v2044_v12, %v325_v30 }
 0x3e9   : > { %v852_v8 = vpop.permute.xlu0 %851 }
 0x3ea   : > { %v381_v17 = vmax.f32 %v2156_v7, 0.0  ;;  %v382_v23 = vmax.f32 %v2159_v11, 0.0  ;;  %v1592_v7 = vld [vmem:[%s2381_s5] sm:$0xff]  }
 0x4a4   : > { %v897_v10 = vpop.f32.mrf.mxu0 }
 0x4a5   : > { %v2161_v14 = vadd.f32 %v897_v10, %v852_v8 }
 0x4a6   : > { %v899_v15 = vpop.f32.mrf.mxu0 }
 0x4a7   : > { %v904_v18 = vmax.f32 %v2161_v14, 0.0  ;;  %v2165_v21 = vadd.f32 %v899_v15, %v852_v8 }
 0x4a8   : > { %v901_v22 = vpop.f32.mrf.mxu0 }
 0x4a9   : > { %v906_v38 = vadd.f32 %v904_v18, %v381_v17  ;;  %v905_v12 = vmax.f32 %v2165_v21, 0.0 }
 0x4aa   : > { %v902_v27 = vpop.f32.mrf.mxu0 }
 0x4ab   : > { %v907_v28 = vadd.f32 %v905_v12, %v382_v23  ;;  %910 = vrot.lane.b32.xlu1 %v906_v38, %s1702_s19 }
 0x4ad   : > { %912 = vrot.lane.b32.xlu0 %v907_v28, %s1702_s19  ;;  %s2396_s19 = smov 110  }
 0x51d   : > { %v911_v33 = vpop.permute.xlu1 %910 }
 0x51e   : > { %v2180_v31 = vsel %vm428_vm5, 0.0, %v911_v33 }
 0x51f   : > { %v913_v34 = vpop.permute.xlu0 %912  ;;  %981 = vrot.lane.b32.xlu1 %v2180_v31, %s1707_s18  ;;  %v939_v39 = vrot.slane %v2180_v31, 4  ;;  %v931_v35 = vmul.f32 %v1936_v53, %v2180_v31  ;;  %v928_v50 = vmul.f32 %v1923_v45, %v2180_v31 }
 0x520   : > { %v2186_v32 = vsel %vm428_vm5, %v911_v33, %v913_v34  ;;  %v919_v42 = vsel %vm428_vm5, %v913_v34, 0.0 }
 0x521   : > { %1020 = vrot.lane.b32.xlu0 %v939_v39, %s1708_s12  ;;  %v1551_v43 = vpack.i.bf16 %v919_v42, %v2186_v32  ;;  %v936_v40 = vmul.f32 %v1905_v36, %v919_v42  ;;  %v940_v29 = vrot.slane %v2186_v32, 4  ;;  %v941_v47 = vrot.slane %v919_v42, 4 }
 0x522   : > { %v935_v48 = vmul.f32 %v2186_v32, %v1927_v46  ;;  %v934_v36 = vmul.f32 %v1907_v37, %v2180_v31  ;;  %v932_v55 = vmul.f32 %v2186_v32, %v1954_v63  ;;  %v933_v53 = vmul.f32 %v1934_v52, %v919_v42 }
 0x523   : > { %1552 = vrot.lane.b32.xlu1 %v1551_v43, %s1707_s18  ;;  %v1566_v44 = vpack.i.bf16 %v941_v47, %v940_v29  ;;  %v994_v49 = vrot.slane %v928_v50, 4  ;;  %v923_v45 = vmul.f32 %v2186_v32, %v1973_v9  ;;  %v924_v46 = vmul.f32 %v1956_v1, %v919_v42 }
 0x524   : > { %v1556_v54 = vpack.i.bf16 %v935_v48, %v934_v36  ;;  %v929_v56 = vmul.f32 %v2186_v32, %v1963_v3  ;;  %v930_v37 = vmul.f32 %v1932_v51, %v919_v42  ;;  %v1561_v57 = vpack.i.bf16 %v933_v53, %v932_v55 }
 0x525   : > { %1037 = vrot.lane.b32.xlu0 %v936_v40, %s1709_s20  ;;  %v926_v63 = vmul.f32 %v2186_v32, %v1983_v13  ;;  %v927_v52 = vmul.f32 %v1947_v59, %v919_v42  ;;  %v1576_v58 = vpack.i.bf16 %v924_v46, %v923_v45  ;;  %v925_v59 = vmul.f32 %v1949_v60, %v2180_v31  ;;  %v1135_v60 = vld [vmem:[%s2382_s6 + $0x8] sm:$0xff] }
 0x526   : > { %v995_v61 = vrot.slane %v929_v56, 4  ;;  %v996_v9 = vrot.slane %v930_v37, 4  ;;  %v922_v13 = vmul.f32 %v1958_v2, %v2180_v31  ;;  %v1136_v2 = vld [vmem:[%s2382_s6 + $0x10] sm:$0xff] }
 0x527   : > { %1010 = vrot.lane.b32.xlu1 %v931_v35, %s1710_s22  ;;  %v969_v1 = vrot.slane %v926_v63, 4  ;;  %v970_v62 = vrot.slane %v927_v52, 4  ;;  %v968_v4 = vrot.slane %v925_v59, 4  ;;  %v921_v63 = vmul.f32 %v1888_v25, %v2186_v32 }
 0x528   : > { %v1581_v51 = vpack.i.bf16 %v996_v9, %v995_v61 }
 0x529   : > { %1567 = vrot.lane.b32.xlu0 %v1566_v44, %s1708_s12  ;;  %v1586_v3 = vpack.i.bf16 %v970_v62, %v969_v1 }
 0x52b   : > { %1557 = vrot.lane.b32.xlu1 %v1556_v54, %s1709_s20 }
 0x52d   : > { %997 = vrot.lane.b32.xlu0 %v994_v49, %s2396_s19 }
 0x52f   : > { %1562 = vrot.lane.b32.xlu1 %v1561_v57, %s1710_s22 }
 0x531   : > { %1577 = vrot.lane.b32.xlu0 %v1576_v58, %s1712_s29 }
 0x533   : > { %1572 = vrot.lane.b32.xlu1 %v1566_v44, %s1713_s21 }
 0x535   : > { %1582 = vrot.lane.b32.xlu0 %v1581_v51, %s2396_s19  ;;  %s1252_s19 = scalar_lea.sflag [#allocation4], %s1854_s17 }
 0x537   : > { %1587 = vrot.lane.b32.xlu1 %v1586_v3, %s1714_s9 }
 0x539   : > { %942 = vrot.lane.b32.xlu0 %v939_v39, %s1713_s21  ;;  %s1266_s21 = sshll.u32 %s2309_s16, 4  ;;  %s2325_s21 = int_to_ptr.vmem [resolvable:$true] %s1266_s21 }
 0x53a   : > { %s1630_s18 = scalar_lea.vmem %s2325_s21, 1024 }
 0x53b   : > { %955 = vrot.lane.b32.xlu1 %v922_v13, %s1712_s29  ;;  %p1631_p11 = scmp.ne.s32.totalorder %s2325_s21, %s1630_s18 }
 0x53d   : > { %971 = vrot.lane.b32.xlu0 %v968_v4, %s1714_s9  ;;  %s2331_s9 = scalar_lea.hbm %s2383_s7, %s1378_s11  ;;  %p1632_p13 = pnand %p1631_p11, %p2398_p12 }
 0x53f   : > { %1063 = vperm.xlu1 %1550, %v1362_v5   ;;  %p1633_p4 = pneg %p1632_p13 }
 0x541   : > { %1140 = vperm.xlu0 %1444, %v1134_v6  }
 0x543   : > { %1145 = vperm.xlu1 %1550, %v1135_v60  }
 0x545   : > { %1150 = vperm.xlu0 %1444, %v1136_v2  }
 0x547   : > { %1155 = vperm.xlu1 %1550, %v1137_v41  }
 0x591   : > { %v982_v30 = vpop.permute.xlu1 %981 }
 0x593   : > { %v1021_v8 = vpop.permute.xlu0 %1020 }
 0x595   : > { %v1553_v10 = vpop.permute.xlu1 %1552 }
 0x596   : > { %v1554_v47 = vunpack.i.l.bf16 %v1553_v10  ;;  %v1555_v36 = vunpack.i.h.bf16 %v1553_v10 }
 0x597   : > { %v1038_v15 = vpop.permute.xlu0 %1037 }
 0x598   : > { %v987_v46 = vsel %vm553_vm12, %v982_v30, %v1554_v47  ;;  %v988_v1 = vsel %vm553_vm12, %v1554_v47, %v1555_v36 }
 0x599   : > { %v1011_v22 = vpop.permute.xlu1 %1010 }
 0x59b   : > { %v1568_v38 = vpop.permute.xlu0 %1567 }
 0x59c   : > { %v1570_v54 = vunpack.i.h.bf16 %v1568_v38  ;;  %v1569_v55 = vunpack.i.l.bf16 %v1568_v38 }
 0x59d   : > { %v1558_v27 = vpop.permute.xlu1 %1557 }
 0x59e   : > { %v1560_v28 = vunpack.i.h.bf16 %v1558_v27  ;;  %v1559_v33 = vunpack.i.l.bf16 %v1558_v27  ;;  %v1026_v62 = vsel %vm595_vm14, %v1021_v8, %v1569_v55  ;;  %v1027_v51 = vsel %vm595_vm14, %v1569_v55, %v1570_v54 }
 0x59f   : > { %v998_v34 = vpop.permute.xlu0 %997  ;;  %v1120_v55 = vrot.slane %v904_v18, 4 }
 0x5a0   : > { %v1040_v39 = vsel %vm609_vm10, %v1560_v28, %v1038_v15  ;;  %v1039_v42 = vsel %vm609_vm10, %v1559_v33, %v1560_v28 }
 0x5a1   : > { %v1056_v43 = vpack.c.bf16 %v1040_v39, %v1040_v39  ;;  %v1563_v40 = vpop.permute.xlu1 %1562  ;;  %v1055_v29 = vpack.c.bf16 %v1039_v42, %v1039_v42  ;;  %v1124_v14 = vsel %vm614_vm3, %v688_v19, %v1120_v55 }
 0x5a2   : > { %v1565_v35 = vunpack.i.h.bf16 %v1563_v40  ;;  %v1564_v48 = vunpack.i.l.bf16 %v1563_v40 }
 0x5a3   : > { %1363 = vmatprep.subr.msk.bf16.mxu1 %vm640_vm11, %v1056_v43  ;;  %v1578_v50 = vpop.permute.xlu0 %1577  ;;  %v1070_v44 = vsel %vm640_vm11, %v1055_v29, 0 }
 0x5a4   : > { %1086 = vmatpush1.bf16.msra.mxu1 %v1070_v44  ;;  %v1016_v56 = vsel %vm584_vm13, %v1011_v22, %v1564_v48  ;;  %v1017_v37 = vsel %vm584_vm13, %v1564_v48, %v1565_v35  ;;  %v1580_v52 = vunpack.i.h.bf16 %v1578_v50  ;;  %v1579_v58 = vunpack.i.l.bf16 %v1578_v50  ;;  %v1361_v35 = vld [vmem:[%s2379_s3 + $0x4] sm:$0x3] }
 0x5a5   : > { %v1573_v53 = vpop.permute.xlu1 %1572  ;;  %v1050_v60 = vsel %vm614_vm3, %v1017_v37, %v1027_v51  ;;  %v1049_v41 = vsel %vm614_vm3, %v1016_v56, %v1026_v62  ;;  %v1121_v44 = vrot.slane %v905_v12, 4  ;;  %v1596_v62 = vld [vmem:[%s1860_s15 + $0x10] sm:$0xff] }
 0x5a6   : > { %v1575_v49 = vunpack.i.h.bf16 %v1573_v53  ;;  %v1574_v45 = vunpack.i.l.bf16 %v1573_v53  ;;  %v962_v30 = vsel %vm525_vm15, %v1579_v58, %v1580_v52 }
 0x5a7   : > { %v1583_v57 = vpop.permute.xlu0 %1582  ;;  %v1125_v56 = vsel %vm614_vm3, %v689_v26, %v1121_v44 }
 0x5a8   : > { %v1585_v61 = vunpack.i.h.bf16 %v1583_v57  ;;  %v1584_v9 = vunpack.i.l.bf16 %v1583_v57  ;;  %v949_v3 = vsel %vm511_vm0, %v1574_v45, %v1575_v49 }
 0x5a9   : > { %v1588_v59 = vpop.permute.xlu1 %1587  ;;  %v1044_v38 = vsel %vm614_vm3, %v921_v63, %v949_v3 }
 0x5aa   : > { %v1003_v13 = vsel %vm570_vm1, %v998_v34, %v1584_v9  ;;  %v1004_v4 = vsel %vm570_vm1, %v1584_v9, %v1585_v61  ;;  %v1590_v5 = vunpack.i.h.bf16 %v1588_v59  ;;  %v1589_v6 = vunpack.i.l.bf16 %v1588_v59 }
 0x5ab   : > { %v943_v25 = vpop.permute.xlu0 %942  ;;  %v1048_v32 = vsel %vm614_vm3, %v988_v1, %v1004_v4  ;;  %v1047_v2 = vsel %vm614_vm3, %v987_v46, %v1003_v13  ;;  %v920_v34 = vmul.f32 %v1886_v24, %v2180_v31 }
 0x5ac   : > { %v978_v8 = vsel %vm542_vm2, %v1589_v6, %v1590_v5  ;;  %v1054_v10 = vpack.c.bf16 %v1050_v60, %v1048_v32  ;;  %v1053_v15 = vpack.c.bf16 %v1049_v41, %v1047_v2  ;;  %v948_v28 = vsel %vm511_vm0, %v943_v25, %v1574_v45  ;;  %v1597_v5 = vld [vmem:[%s1860_s15 + $0x18] sm:$0xff]  ;;  %v1598_v2 = vld [vmem:[%s1860_s15 + $0x20] sm:$0xff] }
 0x5ad   : > { %v956_v22 = vpop.permute.xlu1 %955  ;;  %v1046_v27 = vsel %vm614_vm3, %v962_v30, %v978_v8  ;;  %v1043_v40 = vsel %vm614_vm3, %v920_v34, %v948_v28  ;;  %v1600_v34 = vld [vmem:[%s1860_s15 + $0x30] sm:$0xff] }
 0x5ae   : > { %1087 = vmatprep.subr.bf16.mxu1 %v1054_v10  ;;  %v1052_v33 = vpack.c.bf16 %v1046_v27, %v1044_v38  ;;  %v961_v42 = vsel %vm525_vm15, %v956_v22, %v1579_v58  ;;  %v1599_v22 = vld [vmem:[%s1860_s15 + $0x28] sm:$0xff] }
 0x5af   : > { %v972_v39 = vpop.permute.xlu0 %971  ;;  %1088 = vmatpush1.bf16.msra.mxu1 %v1053_v15 }
 0x5b0   : > { %v977_v43 = vsel %vm542_vm2, %v972_v39, %v1589_v6  ;;  %1089 = vmatprep.subr.bf16.mxu1 %v1052_v33 }
 0x5b1   : > { %v1045_v29 = vsel %vm614_vm3, %v961_v42, %v977_v43 }
 0x5b2   : > { %v1051_v47 = vpack.c.bf16 %v1045_v29, %v1043_v40  ;;  %v1601_v40 = vld [vmem:[%s1860_s15 + $0x38] sm:$0xff] }
 0x5b4   : > { %1090 = vmatpush1.bf16.msra.mxu1 %v1051_v47 }
 0x5b7   : > { %1364 = vmatmul.mubr.msk.bf16.vlgmr.msra.gmra.mxu1 %vm636_vm4, %v1361_v35 }
 0x5ba   : > { %v1064_v24 = vpop.permute.xlu1 %1063 }
 0x5bc   : > { %v1141_v16 = vpop.permute.xlu0 %1140 }
 0x5be   : > { %v1146_v57 = vpop.permute.xlu1 %1145 }
 0x5c0   : > { %v1151_v59 = vpop.permute.xlu0 %1150 }
 0x5c2   : > { %v1156_v8 = vpop.permute.xlu1 %1155 }
 0x677   : > { %v1109_v31 = vpop.f32.mrf.mxu1 }
 0x678   : > { %v1110_v48 = vadd.f32 %v1109_v31, %v1064_v24 }
 0x679   : > { %v1111_v50 = vpop.f32.mrf.mxu1 }
 0x67a   : > { %v1116_v36 = vmax.f32 %v1110_v48, 0.0  ;;  %v1112_v54 = vadd.f32 %v1111_v50, %v1064_v24 }
 0x67b   : > { %v1113_v53 = vpop.f32.mrf.mxu1 }
 0x67c   : > { %v1117_v49 = vmax.f32 %v1112_v54, 0.0  ;;  %v1126_v45 = vsel %vm614_vm3, %v1116_v36, %v381_v17  ;;  %v1594_v17 = vld [vmem:[%s1860_s15] sm:$0xff] }
 0x67d   : > { %v1114_v46 = vpop.f32.mrf.mxu1  ;;  %v1132_v12 = vpack.c.bf16 %v1126_v45, %v1124_v14 }
 0x67e   : > { %v1127_v21 = vsel %vm614_vm3, %v1117_v49, %v382_v23 }
 0x67f   : > { %v1133_v18 = vpack.c.bf16 %v1127_v21, %v1125_v56 }
 0x681   : > { %1188 = vmatprep.subr.bf16.mxu0 %v1133_v18 }
 0x682   : > { %1189 = vmatpush1.bf16.msra.mxu0 %v1132_v12 }
 0x685   : > { %1367 = vmatmul.mubr.msk.bf16.vlgmr.msra.gmra.mxu0 %vm457_vm9, %v1592_v7 }
 0x686   : > { %1216 = vmatprep.mubr.bf16.mxu0 %v1699_v0  ;;  %v1595_v0 = vld [vmem:[%s1860_s15 + $0x8] sm:$0xff]  ;;  %s1634_s15 = sshll.u32 %s1715_s28, 4  ;;  %s1635_s15 = int_to_ptr.vmem [resolvable:$false] %s1634_s15 }
 0x687   : > { %s1636_s12 = scalar_lea.vmem %s1635_s15, 2048  ;;  %p1637_p5 = scmp.lt.s32.totalorder %s2325_s21, %s1635_s15 }
 0x688   : > { %p1638_p7 = scmp.lt.s32.totalorder %s1636_s12, %s1630_s18 }
 0x68a   : > { %p1639_p8 = por %p1638_p7, %p1637_p5 }
 0x68c   : > { %p1640_p10 = pnand %p1639_p8, %p1633_p4 }
 0x68d   : > { %1368 = vmatmul.mubr.msk.bf16.gmra.mxu0 %vm457_vm9, %v1593_v20 }
 0x745   : > { %v1208_v19 = vpop.f32.mrf.mxu0 }
 0x746   : > { %v1209_v26 = vadd.f32 %v1208_v19, %v1141_v16 }
 0x747   : > { %v1210_v11 = vpop.f32.mrf.mxu0 }
 0x748   : > { %v1227_v23 = vadd.f32 %v1594_v17, %v1209_v26  ;;  %v1211_v37 = vadd.f32 %v1210_v11, %v1141_v16 }
 0x749   : > { %v1212_v63 = vpop.f32.mrf.mxu0 }
 0x74a   : > { %v1235_v52 = vmax.f32 %v1227_v23, 0.0  ;;  %v1228_v58 = vadd.f32 %v1595_v0, %v1211_v37  ;;  %v1213_v61 = vadd.f32 %v1212_v63, %v1146_v57 }
 0x74b   : > { %v1214_v9 = vpop.f32.mrf.mxu0 }
 0x74c   : > { %1243 = vst [vmem:[%s2309_s16] sm:$0xff] %v1235_v52  ;;  %v1236_v1 = vmax.f32 %v1228_v58, 0.0  ;;  %v1229_v51 = vadd.f32 %v1596_v62, %v1213_v61  ;;  %v1215_v3 = vadd.f32 %v1214_v9, %v1146_v57 }
 0x74d   : > { %v1218_v13 = vpop.f32.mrf.mxu0 }
 0x74e   : > { %1244 = vst [vmem:[%s2309_s16 + $0x8] sm:$0xff] %v1236_v1  ;;  %v1237_v4 = vmax.f32 %v1229_v51, 0.0  ;;  %v1230_v6 = vadd.f32 %v1597_v5, %v1215_v3  ;;  %v1219_v25 = vadd.f32 %v1218_v13, %v1151_v59 }
 0x74f   : > { %v1220_v32 = vpop.f32.mrf.mxu0 }
 0x750   : > { %1245 = vst [vmem:[%s2309_s16 + $0x10] sm:$0xff] %v1237_v4  ;;  %v1238_v60 = vmax.f32 %v1230_v6, 0.0  ;;  %v1231_v41 = vadd.f32 %v1598_v2, %v1219_v25  ;;  %v1221_v30 = vadd.f32 %v1220_v32, %v1151_v59 }
 0x751   : > { %v1222_v10 = vpop.f32.mrf.mxu0 }
 0x752   : > { %1246 = vst [vmem:[%s2309_s16 + $0x18] sm:$0xff] %v1238_v60  ;;  %v1239_v15 = vmax.f32 %v1231_v41, 0.0  ;;  %v1232_v38 = vadd.f32 %v1599_v22, %v1221_v30  ;;  %v1223_v27 = vadd.f32 %v1222_v10, %v1156_v8 }
 0x753   : > { %v1224_v28 = vpop.f32.mrf.mxu0 }
 0x754   : > { %1247 = vst [vmem:[%s2309_s16 + $0x20] sm:$0xff] %v1239_v15  ;;  %v1240_v33 = vmax.f32 %v1232_v38, 0.0  ;;  %v1233_v39 = vadd.f32 %v1600_v34, %v1223_v27  ;;  %v1225_v42 = vadd.f32 %v1224_v28, %v1156_v8 }
 0x756   : > { %1248 = vst [vmem:[%s2309_s16 + $0x28] sm:$0xff] %v1240_v33  ;;  %v1241_v43 = vmax.f32 %v1233_v39, 0.0  ;;  %v1234_v29 = vadd.f32 %v1601_v40, %v1225_v42 }
 0x758   : > { %1249 = vst [vmem:[%s2309_s16 + $0x30] sm:$0xff] %v1241_v43  ;;  %v1242_v47 = vmax.f32 %v1234_v29, 0.0 }
 0x75a   : > { %1250 = vst [vmem:[%s2309_s16 + $0x38] sm:$0xff] %v1242_v47 }
 0x75b   : > { %1643 = shalt.err (!%p1640_p10)
}
 0x75c   : > { %s1644_s20 = scalar_lea.hbm %s2331_s9, 1024  ;;  %s1648_s16 = scalar_lea.hbm %s2383_s7, 2048 }
 0x75d   : > { %p1645_p0 = scmp.ne.s32.totalorder %s2331_s9, %s1644_s20  ;;  %p1649_p1 = scmp.lt.s32.totalorder %s2331_s9, %s2383_s7 }
 0x75e   : > { %p1650_p3 = scmp.lt.s32.totalorder %s1648_s16, %s1644_s20 }
 0x75f   : > { %p1646_p2 = pnand %p1645_p0, %p2398_p12 }
 0x760   : > { %p1651_p6 = por %p1650_p3, %p1649_p1 }
 0x761   : > { %p1647_p9 = pneg %p1646_p2 }
 0x763   : > { %p1652_p11 = pnand %p1651_p6, %p1647_p9 }
 0x765   : > { %1655 = shalt.err (!%p1652_p11)
}
 0x766   : > { %s1716_s23 = smov 256   ;;  %s2399_s18 = smov 16  }
 0x767   : > { %1381 = dma.vmem_to_hbm [thread:$0]  (%p2398_p12), %s2325_s21, 1024, %s2331_s9, %s1252_s19, %s1716_s23, %s1716_s23, %s2399_s18  }
 0x768 PF: > { %s1281_s28 = sand.u32 1, %s1682_s24   ;;  %p2400_p13 = scmp.ne.s32.totalorder %s2393_s14, 0 }
 0x769   : > { %p2401_p4 = scmp.ge.s32.totalorder %s1694_s27, 2  ;;  %s1282_s15 = scalar_lea.sflag [#allocation4], %s1281_s28 }
 0x76b   : > { %p1388_p5 = pnand %p2401_p4, %p2400_p13 }
 0x76d   : > { %p1389_p7 = pneg %p1388_p5 }
 0x76f   : > { %1677 = dma.done.wait (%p1389_p7), %s1282_s15, 1024  }
 0x770   : > { %1679 = vsyncadd (%p1389_p7), %s1282_s15, 4294966272  ;;  %p20_p8 = scmp.ge.s32.totalorder %s1782_s30, 4   ;;  %s2402_s24 = smov %s1686_s25 }
 0x771   : > { %s2403_s25 = smov %s1690_s26  ;;  %s2404_s26 = smov %s1794_s10 }
 0x772   : > { %s2405_s27 = smov %s1782_s30  ;;  %22 = sbr.rel (!%p20_p8) target bundleno = 5 (0x5), region = 97 }
 0x777   :  { %1287 = vsyncpa [#allocation3], 1 }
 0x778   :  { %1289 = vsyncpa [#allocation3 + $0x1], 1 }
 0x779   :  { %1290 = vsyncpa [#allocation4], 1 }
 0x77a   :  { %1292 = vsyncpa [#allocation4 + $0x1], 1 }

</bundles_post_ra>
